<compile_context>
chip_gen: v7x
topology: tpu7x:2x2x1
jax: 0.10.0
libtpu: 0.0.40
codegen_flags: <defaults>
</compile_context>

<pallas_src>
import functools

import jax
import jax.numpy as jnp
import numpy as np
from jax import lax
from jax.experimental import pallas as pl
from jax.experimental.pallas import tpu as pltpu


# --------------------------------- kernel ------------------------------------

def _dwpw_kernel(x_ref, wdw_ref, wpw_ref, bpw_ref, o_ref, *,
                 bt, ho, wo, cin, cout, ksize, dilation):
  """One grid step: `bt` images, channels-last.

  x_ref   : (bt, H+2p, W+2p, cin)  zero-padded input slab       (VMEM)
  wdw_ref : (ksize*ksize, cin)     depthwise taps                (VMEM)
  wpw_ref : (cin, cout)            pointwise weight (I, O)       (VMEM)
  bpw_ref : (1, cout)              fused bias (bdw@Wpw + bpw)    (VMEM)
  o_ref   : (bt, ho, wo, cout)                                   (VMEM)
  """
  # ---- depthwise kxk, stride 1, dilation d: k*k shifted VPU FMAs ------------
  acc = None
  for kh in range(ksize):
    for kw in range(ksize):
      tap = x_ref[:, kh * dilation:kh * dilation + ho,
                  kw * dilation:kw * dilation + wo, :]           # (bt,ho,wo,cin)
      w_tap = wdw_ref[kh * ksize + kw:kh * ksize + kw + 1, :]    # (1, cin)
      term = w_tap * tap
      acc = term if acc is None else acc + term

  # ---- pointwise 1x1: one MXU matmul over (bt*ho*wo, cin) -------------------
  lhs = acc.reshape(bt * ho * wo, cin)                           # sublane merge
  y = jnp.dot(lhs, wpw_ref[...], preferred_element_type=jnp.float32)
  y = y + bpw_ref[...]                                           # (1, cout)
  o_ref[...] = y.reshape(bt, ho, wo, cout)


# --------------------------------- wrapper -----------------------------------

def depthwise_dilated_conv(x_nchw, params, *, padding=1, dilation=1,
                           block_batch=None):
  """Forward pass of DepthwiseDilatedConv (stride=1) via a Pallas TPU kernel."""
  # TODO(synk): stride > 1 constructor path not implemented (module default is 1).
  B, cin, H, W = x_nchw.shape
  wdw = params["wdw"]                              # (k*k, cin)
  ksize = int(round(wdw.shape[0] ** 0.5))
  cout = params["wpw"].shape[1]

  ho = H + 2 * padding - dilation * (ksize - 1)
  wo = W + 2 * padding - dilation * (ksize - 1)
  hp = H + 2 * padding
  wp = W + 2 * padding

  # Channels-last + explicit zero padding (pure layout plumbing, done by XLA).
  x = jnp.transpose(x_nchw, (0, 2, 3, 1)).astype(jnp.float32)
  x = jnp.pad(x, ((0, 0), (padding, padding), (padding, padding), (0, 0)))

  # Fold the depthwise bias into the pointwise bias (weight-only precompute):
  #   (dw(x) + bdw) @ Wpw + bpw == dw(x) @ Wpw + (bdw @ Wpw + bpw)
  bpw_fused = (params["bdw"] @ params["wpw"] + params["bpw"]).reshape(1, cout)

  # Batch block: largest divisor of B within a ~6 MiB working-set budget,
  # preferring >= 2 grid steps (megacore / second TensorCore on v7x).
  if block_batch is None:
    per_img = 4 * (2 * hp * wp * cin          # double-buffered input block
                   + 2 * ho * wo * cout       # double-buffered output block
                   + 2 * ho * wo * cin)       # in-kernel intermediates
    cap = max(1, (6 << 20) // max(per_img, 1))
    divs = [d for d in range(1, B + 1) if B % d == 0 and d <= cap]
    multi = [d for d in divs if B // d >= 2]
    block_batch = max(multi) if multi else max(divs)
  bt = block_batch

  kernel = functools.partial(_dwpw_kernel, bt=bt, ho=ho, wo=wo, cin=cin,
                             cout=cout, ksize=ksize, dilation=dilation)

  out_nhwc = pl.pallas_call(
      kernel,
      out_shape=jax.ShapeDtypeStruct((B, ho, wo, cout), jnp.float32),
      grid=(B // bt,),
      in_specs=[
          pl.BlockSpec((bt, hp, wp, cin), lambda b: (b, 0, 0, 0)),
          pl.BlockSpec(wdw.shape, lambda b: (0, 0)),
          pl.BlockSpec(params["wpw"].shape, lambda b: (0, 0)),
          pl.BlockSpec((1, cout), lambda b: (0, 0)),
      ],
      out_specs=pl.BlockSpec((bt, ho, wo, cout), lambda b: (b, 0, 0, 0)),
      compiler_params=pltpu.CompilerParams(
          dimension_semantics=("parallel",),
          vmem_limit_bytes=32 * 1024 * 1024),
  )(x, wdw, params["wpw"], bpw_fused)

  return jnp.transpose(out_nhwc, (0, 3, 1, 2))     # back to NCHW


# ----------------------------- parameter setup -------------------------------

def make_params(key, cin, cout, ksize=3):
  ks = jax.random.split(key, 4)
  wdw_oihw = 0.3 * jax.random.normal(ks[0], (cin, 1, ksize, ksize), jnp.float32)
  bdw = 0.1 * jax.random.normal(ks[1], (cin,), jnp.float32)
  wpw_oihw = 0.3 * jax.random.normal(ks[2], (cout, cin, 1, 1), jnp.float32)
  bpw = 0.1 * jax.random.normal(ks[3], (cout,), jnp.float32)

  # Kernel-side layouts: taps (k*k, cin); pointwise weight transposed (cin, cout).
  wdw_k = jnp.transpose(wdw_oihw[:, 0], (1, 2, 0)).reshape(ksize * ksize, cin)
  wpw_k = jnp.transpose(wpw_oihw[:, :, 0, 0], (1, 0))

  return {
      # PyTorch-layout params (for the reference)
      "wdw_oihw": wdw_oihw, "bdw": bdw, "wpw_oihw": wpw_oihw, "bpw": bpw,
      # kernel-layout params
      "wdw": wdw_k, "wpw": wpw_k,
  }


# ------------------------------ pure-JAX reference ----------------------------

def ref_forward(x, params, *, padding=1, dilation=1):
  dn = ("NCHW", "OIHW", "NCHW")
  cin = x.shape[1]
  y = lax.conv_general_dilated(
      x, params["wdw_oihw"], window_strides=(1, 1),
      padding=[(padding, padding), (padding, padding)],
      rhs_dilation=(dilation, dilation),
      feature_group_count=cin, dimension_numbers=dn)
  y = y + params["bdw"][None, :, None, None]
  y = lax.conv_general_dilated(y, params["wpw_oihw"], (1, 1), "VALID",
                               dimension_numbers=dn)
  y = y + params["bpw"][None, :, None, None]
  return y


# ----------------------------------- main -------------------------------------

if __name__ == "__main__":
  B, cin, cout, H, W = 2, 4, 8, 16, 16
  key = jax.random.PRNGKey(0)
  kx, kp = jax.random.split(key)

  x = jax.random.normal(kx, (B, cin, H, W), dtype=jnp.float32)
  params = make_params(kp, cin, cout)

  out = jax.block_until_ready(depthwise_dilated_conv(x, params))
  ref = jax.block_until_ready(ref_forward(x, params))

  assert out.shape == ref.shape, (out.shape, ref.shape)
  np.testing.assert_allclose(np.asarray(out), np.asarray(ref),
                             rtol=1e-4, atol=1e-4)
  print("KERNEL_OK")
</pallas_src>

<mosaic_0001>
module attributes {stable_mosaic.version = 11 : i64} {
  func.func @_dwpw_kernel(%arg0: i32, %arg1: memref<1x18x18x4xf32, #tpu.memory_space<vmem>>, %arg2: memref<9x4xf32, #tpu.memory_space<vmem>>, %arg3: memref<4x8xf32, #tpu.memory_space<vmem>>, %arg4: memref<1x8xf32, #tpu.memory_space<vmem>>, %arg5: memref<1x16x16x8xf32, #tpu.memory_space<vmem>>) attributes {dimension_semantics = [#tpu.dimension_semantics<parallel>], iteration_bounds = array<i64: 2>, scalar_prefetch = 0 : i64, scratch_operands = 0 : i64, tpu.core_type = #tpu.core_type<tc>, window_params = [{transform_indices = @transform_0, window_bounds = array<i64: 1, 18, 18, 4>}, {pipeline_mode = #tpu.pipeline_mode<synchronous>, transform_indices = @transform_1, window_bounds = array<i64: 9, 4>}, {pipeline_mode = #tpu.pipeline_mode<synchronous>, transform_indices = @transform_2, window_bounds = array<i64: 4, 8>}, {pipeline_mode = #tpu.pipeline_mode<synchronous>, transform_indices = @transform_3, window_bounds = array<i64: 1, 8>}, {transform_indices = @transform_4, window_bounds = array<i64: 1, 16, 16, 8>}]} {
    %c0 = arith.constant 0 : index
    %c0_0 = arith.constant 0 : index
    %c0_1 = arith.constant 0 : index
    %c0_2 = arith.constant 0 : index
    %0 = vector.load %arg1[%c0, %c0_0, %c0_1, %c0_2] : memref<1x18x18x4xf32, #tpu.memory_space<vmem>>, vector<1x16x16x4xf32>
    %c0_3 = arith.constant 0 : index
    %c0_4 = arith.constant 0 : index
    %1 = vector.load %arg2[%c0_3, %c0_4] : memref<9x4xf32, #tpu.memory_space<vmem>>, vector<1x4xf32>
    %2 = vector.shape_cast %1 : vector<1x4xf32> to vector<1x1x1x4xf32>
    %3 = vector.broadcast %2 : vector<1x1x1x4xf32> to vector<1x16x16x4xf32>
    %4 = arith.mulf %3, %0 : vector<1x16x16x4xf32>
    %c0_5 = arith.constant 0 : index
    %c0_6 = arith.constant 0 : index
    %c1 = arith.constant 1 : index
    %c0_7 = arith.constant 0 : index
    %5 = vector.load %arg1[%c0_5, %c0_6, %c1, %c0_7] : memref<1x18x18x4xf32, #tpu.memory_space<vmem>>, vector<1x16x16x4xf32>
    %c1_8 = arith.constant 1 : index
    %c0_9 = arith.constant 0 : index
    %6 = vector.load %arg2[%c1_8, %c0_9] : memref<9x4xf32, #tpu.memory_space<vmem>>, vector<1x4xf32>
    %7 = vector.shape_cast %6 : vector<1x4xf32> to vector<1x1x1x4xf32>
    %8 = vector.broadcast %7 : vector<1x1x1x4xf32> to vector<1x16x16x4xf32>
    %9 = arith.mulf %8, %5 : vector<1x16x16x4xf32>
    %10 = arith.addf %4, %9 : vector<1x16x16x4xf32>
    %c0_10 = arith.constant 0 : index
    %c0_11 = arith.constant 0 : index
    %c2 = arith.constant 2 : index
    %c0_12 = arith.constant 0 : index
    %11 = vector.load %arg1[%c0_10, %c0_11, %c2, %c0_12] : memref<1x18x18x4xf32, #tpu.memory_space<vmem>>, vector<1x16x16x4xf32>
    %c2_13 = arith.constant 2 : index
    %c0_14 = arith.constant 0 : index
    %12 = vector.load %arg2[%c2_13, %c0_14] : memref<9x4xf32, #tpu.memory_space<vmem>>, vector<1x4xf32>
    %13 = vector.shape_cast %12 : vector<1x4xf32> to vector<1x1x1x4xf32>
    %14 = vector.broadcast %13 : vector<1x1x1x4xf32> to vector<1x16x16x4xf32>
    %15 = arith.mulf %14, %11 : vector<1x16x16x4xf32>
    %16 = arith.addf %10, %15 : vector<1x16x16x4xf32>
    %c0_15 = arith.constant 0 : index
    %c1_16 = arith.constant 1 : index
    %c0_17 = arith.constant 0 : index
    %c0_18 = arith.constant 0 : index
    %17 = vector.load %arg1[%c0_15, %c1_16, %c0_17, %c0_18] : memref<1x18x18x4xf32, #tpu.memory_space<vmem>>, vector<1x16x16x4xf32>
    %c3 = arith.constant 3 : index
    %c0_19 = arith.constant 0 : index
    %18 = vector.load %arg2[%c3, %c0_19] : memref<9x4xf32, #tpu.memory_space<vmem>>, vector<1x4xf32>
    %19 = vector.shape_cast %18 : vector<1x4xf32> to vector<1x1x1x4xf32>
    %20 = vector.broadcast %19 : vector<1x1x1x4xf32> to vector<1x16x16x4xf32>
    %21 = arith.mulf %20, %17 : vector<1x16x16x4xf32>
    %22 = arith.addf %16, %21 : vector<1x16x16x4xf32>
    %c0_20 = arith.constant 0 : index
    %c1_21 = arith.constant 1 : index
    %c1_22 = arith.constant 1 : index
    %c0_23 = arith.constant 0 : index
    %23 = vector.load %arg1[%c0_20, %c1_21, %c1_22, %c0_23] : memref<1x18x18x4xf32, #tpu.memory_space<vmem>>, vector<1x16x16x4xf32>
    %c4 = arith.constant 4 : index
    %c0_24 = arith.constant 0 : index
    %24 = vector.load %arg2[%c4, %c0_24] : memref<9x4xf32, #tpu.memory_space<vmem>>, vector<1x4xf32>
    %25 = vector.shape_cast %24 : vector<1x4xf32> to vector<1x1x1x4xf32>
    %26 = vector.broadcast %25 : vector<1x1x1x4xf32> to vector<1x16x16x4xf32>
    %27 = arith.mulf %26, %23 : vector<1x16x16x4xf32>
    %28 = arith.addf %22, %27 : vector<1x16x16x4xf32>
    %c0_25 = arith.constant 0 : index
    %c1_26 = arith.constant 1 : index
    %c2_27 = arith.constant 2 : index
    %c0_28 = arith.constant 0 : index
    %29 = vector.load %arg1[%c0_25, %c1_26, %c2_27, %c0_28] : memref<1x18x18x4xf32, #tpu.memory_space<vmem>>, vector<1x16x16x4xf32>
    %c5 = arith.constant 5 : index
    %c0_29 = arith.constant 0 : index
    %30 = vector.load %arg2[%c5, %c0_29] : memref<9x4xf32, #tpu.memory_space<vmem>>, vector<1x4xf32>
    %31 = vector.shape_cast %30 : vector<1x4xf32> to vector<1x1x1x4xf32>
    %32 = vector.broadcast %31 : vector<1x1x1x4xf32> to vector<1x16x16x4xf32>
    %33 = arith.mulf %32, %29 : vector<1x16x16x4xf32>
    %34 = arith.addf %28, %33 : vector<1x16x16x4xf32>
    %c0_30 = arith.constant 0 : index
    %c2_31 = arith.constant 2 : index
    %c0_32 = arith.constant 0 : index
    %c0_33 = arith.constant 0 : index
    %35 = vector.load %arg1[%c0_30, %c2_31, %c0_32, %c0_33] : memref<1x18x18x4xf32, #tpu.memory_space<vmem>>, vector<1x16x16x4xf32>
    %c6 = arith.constant 6 : index
    %c0_34 = arith.constant 0 : index
    %36 = vector.load %arg2[%c6, %c0_34] : memref<9x4xf32, #tpu.memory_space<vmem>>, vector<1x4xf32>
    %37 = vector.shape_cast %36 : vector<1x4xf32> to vector<1x1x1x4xf32>
    %38 = vector.broadcast %37 : vector<1x1x1x4xf32> to vector<1x16x16x4xf32>
    %39 = arith.mulf %38, %35 : vector<1x16x16x4xf32>
    %40 = arith.addf %34, %39 : vector<1x16x16x4xf32>
    %c0_35 = arith.constant 0 : index
    %c2_36 = arith.constant 2 : index
    %c1_37 = arith.constant 1 : index
    %c0_38 = arith.constant 0 : index
    %41 = vector.load %arg1[%c0_35, %c2_36, %c1_37, %c0_38] : memref<1x18x18x4xf32, #tpu.memory_space<vmem>>, vector<1x16x16x4xf32>
    %c7 = arith.constant 7 : index
    %c0_39 = arith.constant 0 : index
    %42 = vector.load %arg2[%c7, %c0_39] : memref<9x4xf32, #tpu.memory_space<vmem>>, vector<1x4xf32>
    %43 = vector.shape_cast %42 : vector<1x4xf32> to vector<1x1x1x4xf32>
    %44 = vector.broadcast %43 : vector<1x1x1x4xf32> to vector<1x16x16x4xf32>
    %45 = arith.mulf %44, %41 : vector<1x16x16x4xf32>
    %46 = arith.addf %40, %45 : vector<1x16x16x4xf32>
    %c0_40 = arith.constant 0 : index
    %c2_41 = arith.constant 2 : index
    %c2_42 = arith.constant 2 : index
    %c0_43 = arith.constant 0 : index
    %47 = vector.load %arg1[%c0_40, %c2_41, %c2_42, %c0_43] : memref<1x18x18x4xf32, #tpu.memory_space<vmem>>, vector<1x16x16x4xf32>
    %c8 = arith.constant 8 : index
    %c0_44 = arith.constant 0 : index
    %48 = vector.load %arg2[%c8, %c0_44] : memref<9x4xf32, #tpu.memory_space<vmem>>, vector<1x4xf32>
    %49 = vector.shape_cast %48 : vector<1x4xf32> to vector<1x1x1x4xf32>
    %50 = vector.broadcast %49 : vector<1x1x1x4xf32> to vector<1x16x16x4xf32>
    %51 = arith.mulf %50, %47 : vector<1x16x16x4xf32>
    %52 = arith.addf %46, %51 : vector<1x16x16x4xf32>
    %53 = vector.shape_cast %52 : vector<1x16x16x4xf32> to vector<256x4xf32>
    %c0_45 = arith.constant 0 : index
    %c0_46 = arith.constant 0 : index
    %54 = vector.load %arg3[%c0_45, %c0_46] : memref<4x8xf32, #tpu.memory_space<vmem>>, vector<4x8xf32>
    %cst = arith.constant dense<0.000000e+00> : vector<256x8xf32>
    %55 = tpu.matmul %53, %54, %cst {dimension_numbers = #tpu.dot_dimension_numbers<[1], [0], [0], [1], [0, 0, 1, 1], [], []>} : vector<256x4xf32>, vector<4x8xf32>, vector<256x8xf32> -> vector<256x8xf32>
    %c0_47 = arith.constant 0 : index
    %c0_48 = arith.constant 0 : index
    %56 = vector.load %arg4[%c0_47, %c0_48] : memref<1x8xf32, #tpu.memory_space<vmem>>, vector<1x8xf32>
    %57 = vector.broadcast %56 : vector<1x8xf32> to vector<256x8xf32>
    %58 = arith.addf %55, %57 : vector<256x8xf32>
    %59 = vector.shape_cast %58 : vector<256x8xf32> to vector<1x16x16x8xf32>
    %c0_49 = arith.constant 0 : index
    %c0_50 = arith.constant 0 : index
    %c0_51 = arith.constant 0 : index
    %c0_52 = arith.constant 0 : index
    %60 = vector.load %arg5[%c0_49, %c0_50, %c0_51, %c0_52] : memref<1x16x16x8xf32, #tpu.memory_space<vmem>>, vector<1x16x16x8xf32>
    tpu.vector_store %arg5[%c0_49, %c0_50, %c0_51, %c0_52], %59 {strides = array<i32>} : memref<1x16x16x8xf32, #tpu.memory_space<vmem>>, vector<1x16x16x8xf32>,
    return
  }
  func.func @transform_0(%arg0: i32) -> (i32, i32, i32, i32) {
    %c0_i32 = arith.constant 0 : i32
    %c0_i32_0 = arith.constant 0 : i32
    %c0_i32_1 = arith.constant 0 : i32
    %c0_i32_2 = arith.constant 0 : i32
    return %arg0, %c0_i32, %c0_i32_0, %c0_i32_1 : i32, i32, i32, i32
  }
  func.func @transform_1(%arg0: i32) -> (i32, i32) {
    %c0_i32 = arith.constant 0 : i32
    %c0_i32_0 = arith.constant 0 : i32
    %c0_i32_1 = arith.constant 0 : i32
    return %c0_i32, %c0_i32_0 : i32, i32
  }
  func.func @transform_2(%arg0: i32) -> (i32, i32) {
    %c0_i32 = arith.constant 0 : i32
    %c0_i32_0 = arith.constant 0 : i32
    %c0_i32_1 = arith.constant 0 : i32
    return %c0_i32, %c0_i32_0 : i32, i32
  }
  func.func @transform_3(%arg0: i32) -> (i32, i32) {
    %c0_i32 = arith.constant 0 : i32
    %c0_i32_0 = arith.constant 0 : i32
    %c0_i32_1 = arith.constant 0 : i32
    return %c0_i32, %c0_i32_0 : i32, i32
  }
  func.func @transform_4(%arg0: i32) -> (i32, i32, i32, i32) {
    %c0_i32 = arith.constant 0 : i32
    %c0_i32_0 = arith.constant 0 : i32
    %c0_i32_1 = arith.constant 0 : i32
    %c0_i32_2 = arith.constant 0 : i32
    return %arg0, %c0_i32, %c0_i32_0, %c0_i32_1 : i32, i32, i32, i32
  }
}

</mosaic_0001>

<bundles_post_ra>
// kernel: tpu_custom_call.1
= control target key start
LH: loop header
LB: loop body
LE: loop exit
PB: predicated region body
PF: predicated region fallthrough
CT: control target
= control target key end

     0   :  { %s1881_s15 = smov 0   ;;  %s2979_s0 = inlined_call_operand.vmem [shape: f32[2,18,18,4], index: 0, kind: input, shape index: {}]   ;;  %s2980_s1 = inlined_call_operand.vmem [shape: f32[9,4], index: 1, kind: input, shape index: {}]   ;;  %s2981_s2 = inlined_call_operand.vmem [shape: f32[4,8], index: 2, kind: input, shape index: {}]   ;;  %s2982_s3 = inlined_call_operand.vmem [shape: f32[1,8], index: 3, kind: input, shape index: {}]   ;;  %s2983_s4 = inlined_call_operand.vmem [shape: f32[2,16,16,8], index: 4, kind: output, shape index: {}]  }
   0x1 LB: > { %s1499_s16 = sadd.s32 4294967295, %s1854_s15   ;;  %p1503_p0 = scmp.ge.s32.totalorder %s1854_s15, 1  ;;  %s1854_s15 = sphi %s1881_s15, %s14_s15  }
   0x2   : > { %p162_p1 = scmp.lt.s32.totalorder %s1854_s15, 3 }
   0x4   : > { %p163_p2 = pnand %p1503_p0, %p162_p1 }
   0x5   : > { %v1077_v0 = vld [vmem:[%s2981_s2] sm:$0xf] (!%p163_p2)  ;;  %vm1182_vm0 = vcmask (!%p163_p2), 1043456   ;;  %p188_p3 = scmp.lt.s32.totalorder (!%p163_p2), %s1499_s16, 1  ;;  %v1923_v5 = vld [vmem:[%s2980_s1 + $0x4] ss:$0 sm:$0xff] (!%p163_p2) }
   0x6   : > { %166 = sbr.rel (%p163_p2) target bundleno = 379 (0x17b), region = 36  ;;  %1778 = vmatprep.subr.msk.mxu0 (!%p163_p2), %vm1182_vm0, %v1077_v0  ;;  %1828 = vmatprep.subr.msk.mxu1 (!%p163_p2), %vm1182_vm0, %v1077_v0  ;;  %v1898_v1 = vld [vmem:[%s2980_s1] ss:$0 sm:$0xff] (!%p163_p2)  ;;  %v1903_v2 = vld [vmem:[%s2980_s1 + $0x1] ss:$0 sm:$0xff] (!%p163_p2)  ;;  %vm1085_vm1 = vcmask (!%p163_p2), 31744  }
   0x7   : > { %1779 = vmatpush3.msk.msra.mxu0 (!%p163_p2), %vm1182_vm0, %v1077_v0  ;;  %1829 = vmatpush3.msk.msra.mxu1 (!%p163_p2), %vm1182_vm0, %v1077_v0  ;;  %v1908_v3 = vld [vmem:[%s2980_s1 + $0x2] ss:$0 sm:$0xff] (!%p163_p2)  ;;  %v1918_v4 = vld [vmem:[%s2980_s1 + $0x3] ss:$0 sm:$0xff] (!%p163_p2)  ;;  %v1928_v6 = vld [vmem:[%s2980_s1 + $0x5] ss:$0 sm:$0xff] (!%p163_p2) }
   0x8   : > { %v1936_v10 = vld [vmem:[%s2980_s1 + $0x6] ss:$0 sm:$0xff] (!%p163_p2)  ;;  %v1945_v15 = vld [vmem:[%s2980_s1 + $0x7] ss:$0 sm:$0xff] (!%p163_p2)  ;;  %v1950_v16 = vld [vmem:[%s2980_s1 + $0x8] ss:$0 sm:$0xff] (!%p163_p2) }
   0x9   : > { %vm1411_vm2 = vcmask (!%p163_p2), 64512  }
   0xd   : > { %s2985_s16 = smov (!%p188_p3, %s1499_s16), 1 }
   0xe   : > { %s1830_s19 = smul.u32 432, %s2985_s16  ;;  %s1744_s10 = sshll.u32 %s2985_s16, 8 }
   0xf   : > { %s2878_s14 = scalar_lea.vmem %s2983_s4, %s1744_s10 }
  0x10   : > { %s1913_s28 = scalar_lea.vmem %s2979_s0, %s1830_s19 }
  0x11   : > { %v198_v7 = vld [vmem:[%s1913_s28] sm:$0xff]  ;;  %v1510_v14 = vld [vmem:[%s1913_s28 + $0x18] sm:$0xff]  ;;  %v1957_v19 = vld [vmem:[%s1913_s28 + $0x30] sm:$0xff] }
  0x12   : > { %v267_v8 = vld [vmem:[%s1913_s28 + $0x1] sm:$0xff]  ;;  %v235_v11 = vmul.f32 %v1898_v1, %v198_v7  ;;  %v1543_v17 = vld [vmem:[%s1913_s28 + $0x19] sm:$0xff]  ;;  %v507_v21 = vmul.f32 %v1918_v4, %v1510_v14  ;;  %v1967_v27 = vld [vmem:[%s1913_s28 + $0x31] sm:$0xff]  ;;  %v237_v33 = vmul.f32 %v1510_v14, %v1898_v1  ;;  %v811_v35 = vmul.f32 %v1936_v10, %v1957_v19 }
  0x13   : > { %v368_v9 = vld [vmem:[%s1913_s28 + $0x2] sm:$0xff]  ;;  %v304_v12 = vmul.f32 %v1903_v2, %v267_v8  ;;  %v1954_v18 = vld [vmem:[%s1913_s28 + $0x1a] sm:$0xff]  ;;  %v608_v22 = vmul.f32 %v1923_v5, %v1543_v17  ;;  %v1970_v28 = vld [vmem:[%s1913_s28 + $0x32] sm:$0xff]  ;;  %v912_v36 = vmul.f32 %v1945_v15, %v1967_v27  ;;  %v306_v46 = vmul.f32 %v1543_v17, %v1903_v2 }
  0x14   : > { %v405_v13 = vmul.f32 %v1908_v3, %v368_v9  ;;  %v709_v23 = vmul.f32 %v1928_v6, %v1954_v18  ;;  %v214_v24 = vld [vmem:[%s1913_s28 + $0xc0] sm:$0xff]  ;;  %v1976_v32 = vld [vmem:[%s1913_s28 + $0xd8] sm:$0xff]  ;;  %v1985_v37 = vmul.f32 %v1950_v16, %v1970_v28  ;;  %v199_v43 = vld [vmem:[%s1913_s28 + $0x8] sm:$0xff] }
  0x15   : > { %v336_v20 = vadd.f32 %v304_v12, %v235_v11  ;;  %v283_v25 = vld [vmem:[%s1913_s28 + $0xc1] sm:$0xff]  ;;  %v251_v29 = vmul.f32 %v1898_v1, %v214_v24  ;;  %v1988_v38 = vld [vmem:[%s1913_s28 + $0xd9] sm:$0xff]  ;;  %v523_v41 = vmul.f32 %v1918_v4, %v1976_v32  ;;  %v268_v44 = vld [vmem:[%s1913_s28 + $0x9] sm:$0xff]  ;;  %v236_v50 = vmul.f32 %v1898_v1, %v199_v43 }
  0x16   : > { %v384_v26 = vld [vmem:[%s1913_s28 + $0xc2] sm:$0xff]  ;;  %v320_v30 = vmul.f32 %v1903_v2, %v283_v25  ;;  %v1991_v39 = vld [vmem:[%s1913_s28 + $0xda] sm:$0xff]  ;;  %v624_v42 = vmul.f32 %v1923_v5, %v1988_v38  ;;  %v369_v45 = vld [vmem:[%s1913_s28 + $0xa] sm:$0xff]  ;;  %v305_v51 = vmul.f32 %v1903_v2, %v268_v44 }
  0x17   : > { %v421_v31 = vmul.f32 %v1908_v3, %v384_v26  ;;  %v437_v34 = vadd.f32 %v405_v13, %v336_v20  ;;  %v2002_v48 = vld [vmem:[%s1913_s28 + $0xf0] sm:$0xff]  ;;  %v406_v52 = vmul.f32 %v1908_v3, %v369_v45  ;;  %v2011_v53 = vld [vmem:[%s1913_s28 + $0x20] sm:$0xff]  ;;  %v725_v55 = vmul.f32 %v1928_v6, %v1991_v39  ;;  %v215_v0 = vld [vmem:[%s1913_s28 + $0xc8] sm:$0xff] }
  0x18   : > { %v352_v40 = vadd.f32 %v320_v30, %v251_v29  ;;  %v2005_v49 = vld [vmem:[%s1913_s28 + $0xf1] sm:$0xff]  ;;  %v827_v56 = vmul.f32 %v1936_v10, %v2002_v48  ;;  %v2023_v59 = vld [vmem:[%s1913_s28 + $0x21] sm:$0xff]  ;;  %v337_v62 = vadd.f32 %v305_v51, %v236_v50  ;;  %v508_v63 = vmul.f32 %v1918_v4, %v2011_v53  ;;  %v284_v7 = vld [vmem:[%s1913_s28 + $0xc9] sm:$0xff] }
  0x19   : > { %v539_v47 = vadd.f32 %v507_v21, %v437_v34  ;;  %v928_v57 = vmul.f32 %v1945_v15, %v2005_v49  ;;  %v2020_v58 = vld [vmem:[%s1913_s28 + $0xf2] sm:$0xff]  ;;  %v385_v8 = vld [vmem:[%s1913_s28 + $0xca] sm:$0xff]  ;;  %v609_v11 = vmul.f32 %v1923_v5, %v2023_v59  ;;  %v2035_v12 = vld [vmem:[%s1913_s28 + $0x22] sm:$0xff]  ;;  %v252_v13 = vmul.f32 %v1898_v1, %v215_v0 }
  0x1a   : > { %v453_v54 = vadd.f32 %v421_v31, %v352_v40  ;;  %v1029_v61 = vmul.f32 %v1950_v16, %v2020_v58  ;;  %v321_v14 = vmul.f32 %v1903_v2, %v284_v7  ;;  %v2040_v17 = vld [vmem:[%s1913_s28 + $0xe0] sm:$0xff]  ;;  %v438_v21 = vadd.f32 %v406_v52, %v337_v62  ;;  %v2045_v24 = vld [vmem:[%s1913_s28 + $0x38] sm:$0xff] }
  0x1b   : > { %v640_v60 = vadd.f32 %v608_v22, %v539_v47  ;;  %v710_v22 = vmul.f32 %v1928_v6, %v2035_v12  ;;  %v422_v25 = vmul.f32 %v1908_v3, %v385_v8  ;;  %v812_v29 = vmul.f32 %v1936_v10, %v2045_v24  ;;  %v2051_v30 = vld [vmem:[%s1913_s28 + $0x39] sm:$0xff]  ;;  %v2063_v44 = vld [vmem:[%s1913_s28 + $0xe1] sm:$0xff] }
  0x1c   : > { %v555_v9 = vadd.f32 %v523_v41, %v453_v54  ;;  %v2054_v31 = vld [vmem:[%s1913_s28 + $0x3a] sm:$0xff]  ;;  %v353_v34 = vadd.f32 %v321_v14, %v252_v13  ;;  %v540_v41 = vadd.f32 %v508_v63, %v438_v21  ;;  %v913_v43 = vmul.f32 %v1945_v15, %v2051_v30  ;;  %v2093_v21 = vld [vmem:[%s1913_s28 + $0x48] sm:$0xff] }
  0x1d   : > { %v741_v20 = vadd.f32 %v709_v23, %v640_v60  ;;  %v524_v23 = vmul.f32 %v1918_v4, %v2040_v17  ;;  %v625_v50 = vmul.f32 %v1923_v5, %v2063_v44  ;;  %v338_v51 = vadd.f32 %v306_v46, %v237_v33  ;;  %v2068_v60 = vld [vmem:[%s1913_s28 + $0xe2] sm:$0xff]  ;;  %v2083_v8 = vld [vmem:[%s1913_s28 + $0xf9] sm:$0xff] }
  0x1e   : > { %v656_v26 = vadd.f32 %v624_v42, %v555_v9  ;;  %v1014_v42 = vmul.f32 %v1950_v16, %v2054_v31  ;;  %v454_v47 = vadd.f32 %v422_v25, %v353_v34  ;;  %v641_v54 = vadd.f32 %v609_v11, %v540_v41 }
  0x1f   : > { %v843_v40 = vadd.f32 %v811_v35, %v741_v20  ;;  %v2071_v35 = vld [vmem:[%s1913_s28 + $0xf8] sm:$0xff]  ;;  %v407_v62 = vmul.f32 %v1954_v18, %v1908_v3  ;;  %v509_v63 = vmul.f32 %v1957_v19, %v1918_v4  ;;  %v726_v7 = vmul.f32 %v1928_v6, %v2068_v60 }
  0x20   : > { %v757_v45 = vadd.f32 %v725_v55, %v656_v26  ;;  %v556_v55 = vadd.f32 %v524_v23, %v454_v47  ;;  %v828_v33 = vmul.f32 %v1936_v10, %v2071_v35  ;;  %v742_v46 = vadd.f32 %v710_v22, %v641_v54 }
  0x21   : > { %v944_v52 = vadd.f32 %v912_v36, %v843_v40  ;;  %v439_v9 = vadd.f32 %v407_v62, %v338_v51  ;;  %v610_v18 = vmul.f32 %v1967_v27, %v1923_v5  ;;  %v929_v13 = vmul.f32 %v1945_v15, %v2083_v8  ;;  %v2119_v62 = vld [vmem:[%s1913_s28 + $0x4a] sm:$0xff] }
  0x22   : > { %v859_v0 = vadd.f32 %v827_v56, %v757_v45  ;;  %v657_v56 = vadd.f32 %v625_v50, %v556_v55  ;;  %v711_v14 = vmul.f32 %v1970_v28, %v1928_v6  ;;  %v253_v22 = vmul.f32 %v1976_v32, %v1898_v1  ;;  %v2107_v45 = vld [vmem:[%s1913_s28 + $0x49] sm:$0xff] }
  0x23   : > { %v1045_v36 = vadd.f32 %v1985_v37, %v944_v52  ;;  %v844_v37 = vadd.f32 %v812_v29, %v742_v46  ;;  %v541_v20 = vadd.f32 %v509_v63, %v439_v9  ;;  %v813_v34 = vmul.f32 %v1936_v10, %v2093_v21  ;;  %v2104_v29 = vld [vmem:[%s1913_s28 + $0xfa] sm:$0xff] }
  0x24   : > { %v960_v11 = vadd.f32 %v928_v57, %v859_v0  ;;  %v322_v57 = vmul.f32 %v1988_v38, %v1903_v2  ;;  %v758_v26 = vadd.f32 %v726_v7, %v657_v56  ;;  %v423_v23 = vmul.f32 %v1991_v39, %v1908_v3 }
  0x25   : > { %1780 = vmatprep.mubr.msk.f32.mxu0 %vm1085_vm1, %v1045_v36  ;;  %v945_v40 = vadd.f32 %v913_v43, %v844_v37  ;;  %v642_v41 = vadd.f32 %v610_v18, %v541_v20  ;;  %v525_v32 = vmul.f32 %v2002_v48, %v1918_v4  ;;  %v914_v39 = vmul.f32 %v1945_v15, %v2107_v45 }
  0x26   : > { %v1061_v25 = vadd.f32 %v1029_v61, %v960_v11  ;;  %v354_v47 = vadd.f32 %v322_v57, %v253_v22  ;;  %v860_v38 = vadd.f32 %v828_v33, %v758_v26  ;;  %v1030_v61 = vmul.f32 %v1950_v16, %v2104_v29 }
  0x27   : > { %v1046_v43 = vadd.f32 %v1014_v42, %v945_v40  ;;  %v743_v50 = vadd.f32 %v711_v14, %v642_v41  ;;  %v626_v52 = vmul.f32 %v2005_v49, %v1923_v5  ;;  %v238_v63 = vmul.f32 %v2011_v53, %v1898_v1  ;;  %v2133_v53 = vld [vmem:[%s1913_s28 + $0x108] sm:$0xff]  ;;  %v2161_v41 = vld [vmem:[%s1913_s28 + $0x50] sm:$0xff] }
  0x28   : > { %1804 = vmatprep.mubr.msk.f32.mxu1 %vm1085_vm1, %v1061_v25  ;;  %v455_v51 = vadd.f32 %v423_v23, %v354_v47  ;;  %v961_v54 = vadd.f32 %v929_v13, %v860_v38  ;;  %v307_v0 = vmul.f32 %v2023_v59, %v1903_v2  ;;  %v408_v55 = vmul.f32 %v2035_v12, %v1908_v3  ;;  %v2143_v13 = vld [vmem:[%s1913_s28 + $0x109] sm:$0xff] }
  0x29   : > { %1781 = vmatmul.mubr.msk.f32.vlgmr.msra.gmra.mrb[0].mxu0 %vm1085_vm1, %v1046_v43  ;;  %v845_v42 = vadd.f32 %v813_v34, %v743_v50  ;;  %v1015_v7 = vmul.f32 %v1950_v16, %v2119_v62  ;;  %v727_v36 = vmul.f32 %v2020_v58, %v1928_v6  ;;  %v510_v59 = vmul.f32 %v2045_v24, %v1918_v4  ;;  %v2146_v14 = vld [vmem:[%s1913_s28 + $0x10a] sm:$0xff]  ;;  %v2176_v50 = vld [vmem:[%s1913_s28 + $0x52] sm:$0xff] }
  0x2a   : > { %v557_v33 = vadd.f32 %v525_v32, %v455_v51  ;;  %v1062_v46 = vadd.f32 %v1030_v61, %v961_v54  ;;  %v339_v9 = vadd.f32 %v307_v0, %v238_v63  ;;  %v829_v11 = vmul.f32 %v1936_v10, %v2133_v53  ;;  %v2173_v43 = vld [vmem:[%s1913_s28 + $0x51] sm:$0xff] }
  0x2b   : > { %v946_v18 = vadd.f32 %v914_v39, %v845_v42  ;;  %v611_v56 = vmul.f32 %v2051_v30, %v1923_v5  ;;  %v254_v20 = vmul.f32 %v2040_v17, %v1898_v1  ;;  %v323_v22 = vmul.f32 %v2063_v44, %v1903_v2 }
  0x2c   : > { %v658_v12 = vadd.f32 %v626_v52, %v557_v33  ;;  %1805 = vmatmul.mubr.msk.f32.vlgmr.msra.gmra.mrb[0].mxu1 %vm1085_vm1, %v1062_v46  ;;  %v440_v37 = vadd.f32 %v408_v55, %v339_v9  ;;  %v424_v57 = vmul.f32 %v2068_v60, %v1908_v3  ;;  %v930_v34 = vmul.f32 %v1945_v15, %v2143_v13  ;;  %v2189_v33 = vld [vmem:[%s1913_s28 + $0x110] sm:$0xff] }
  0x2d   : > { %v1047_v25 = vadd.f32 %v1015_v7, %v946_v18  ;;  %v1031_v23 = vmul.f32 %v1950_v16, %v2146_v14  ;;  %v712_v17 = vmul.f32 %v2054_v31, %v1928_v6  ;;  %v355_v44 = vadd.f32 %v323_v22, %v254_v20 }
  0x2e   : > { %v759_v26 = vadd.f32 %v727_v36, %v658_v12  ;;  %v542_v40 = vadd.f32 %v510_v59, %v440_v37  ;;  %v526_v60 = vmul.f32 %v2071_v35, %v1918_v4  ;;  %v814_v32 = vmul.f32 %v1936_v10, %v2161_v41 }
  0x2f   : > { %1783 = vmatprep.mubr.msk.f32.mxu0 %vm1085_vm1, %v1047_v25  ;;  %v627_v38 = vmul.f32 %v2083_v8, %v1923_v5  ;;  %v239_v61 = vmul.f32 %v1957_v19, %v1898_v1  ;;  %v456_v51 = vadd.f32 %v424_v57, %v355_v44  ;;  %v308_v52 = vmul.f32 %v1967_v27, %v1903_v2 }
  0x30   : > { %v861_v47 = vadd.f32 %v829_v11, %v759_v26  ;;  %v643_v39 = vadd.f32 %v611_v56, %v542_v40  ;;  %v409_v54 = vmul.f32 %v1970_v28, %v1908_v3  ;;  %v915_v0 = vmul.f32 %v1945_v15, %v2173_v43  ;;  %v2200_v11 = vld [vmem:[%s1913_s28 + $0x111] sm:$0xff] }
  0x31   : > { %v1016_v19 = vmul.f32 %v1950_v16, %v2176_v50  ;;  %v728_v55 = vmul.f32 %v2104_v29, %v1928_v6  ;;  %v558_v7 = vadd.f32 %v526_v60, %v456_v51  ;;  %v340_v36 = vadd.f32 %v308_v52, %v239_v61  ;;  %v2228_v61 = vld [vmem:[%s1913_s28 + $0x61] sm:$0xff] }
  0x32   : > { %v962_v63 = vadd.f32 %v930_v34, %v861_v47  ;;  %v744_v42 = vadd.f32 %v712_v17, %v643_v39  ;;  %v511_v27 = vmul.f32 %v2093_v21, %v1918_v4  ;;  %v830_v46 = vmul.f32 %v1936_v10, %v2189_v33  ;;  %v2214_v34 = vld [vmem:[%s1913_s28 + $0x112] sm:$0xff]  ;;  %v2231_v39 = vld [vmem:[%s1913_s28 + $0x62] sm:$0xff] }
  0x33   : > { %v612_v9 = vmul.f32 %v2107_v45, %v1923_v5  ;;  %v255_v59 = vmul.f32 %v2002_v48, %v1898_v1  ;;  %v659_v12 = vadd.f32 %v627_v38, %v558_v7  ;;  %v441_v56 = vadd.f32 %v409_v54, %v340_v36  ;;  %v2245_v7 = vld [vmem:[%s1913_s28 + $0x120] sm:$0xff] }
  0x34   : > { %v1063_v28 = vadd.f32 %v1031_v23, %v962_v63  ;;  %v846_v18 = vadd.f32 %v814_v32, %v744_v42  ;;  %v324_v37 = vmul.f32 %v2005_v49, %v1903_v2  ;;  %v931_v20 = vmul.f32 %v1945_v15, %v2200_v11  ;;  %v2217_v23 = vld [vmem:[%s1913_s28 + $0x60] sm:$0xff] }
  0x35   : > { %v713_v22 = vmul.f32 %v2119_v62, %v1928_v6  ;;  %v425_v48 = vmul.f32 %v2020_v58, %v1908_v3  ;;  %v527_v57 = vmul.f32 %v2133_v53, %v1918_v4  ;;  %v760_v26 = vadd.f32 %v728_v55, %v659_v12  ;;  %v2248_v36 = vld [vmem:[%s1913_s28 + $0x121] sm:$0xff] }
  0x36   : > { %1807 = vmatprep.mubr.msk.f32.mxu1 %vm1085_vm1, %v1063_v28  ;;  %v947_v25 = vadd.f32 %v915_v0, %v846_v18  ;;  %v543_v49 = vadd.f32 %v511_v27, %v441_v56  ;;  %v356_v40 = vadd.f32 %v324_v37, %v255_v59  ;;  %v1032_v17 = vmul.f32 %v1950_v16, %v2214_v34  ;;  %v2259_v12 = vld [vmem:[%s1913_s28 + $0x122] sm:$0xff] }
  0x37   : > { %v815_v44 = vmul.f32 %v1936_v10, %v2217_v23  ;;  %v628_v58 = vmul.f32 %v2143_v13, %v1923_v5  ;;  %v240_v60 = vmul.f32 %v2045_v24, %v1898_v1  ;;  %v862_v32 = vadd.f32 %v830_v46, %v760_v26  ;;  %v2273_v26 = vld [vmem:[%s1913_s28 + $0x68] sm:$0xff] }
  0x38   : > { %v1048_v47 = vadd.f32 %v1016_v19, %v947_v25  ;;  %v644_v38 = vadd.f32 %v612_v9, %v543_v49  ;;  %v457_v51 = vadd.f32 %v425_v48, %v356_v40  ;;  %v916_v52 = vmul.f32 %v1945_v15, %v2228_v61 }
  0x39   : > { %v1017_v54 = vmul.f32 %v1950_v16, %v2231_v39  ;;  %v309_v63 = vmul.f32 %v2051_v30, %v1903_v2  ;;  %v410_v24 = vmul.f32 %v2054_v31, %v1908_v3  ;;  %v963_v0 = vadd.f32 %v931_v20, %v862_v32  ;;  %v2284_v32 = vld [vmem:[%s1913_s28 + $0x69] sm:$0xff] }
  0x3a   : > { %1784 = vmatmul.mubr.msk.f32.gmra.mrb[2].mxu0 %vm1085_vm1, %v1048_v47  ;;  %v745_v19 = vadd.f32 %v713_v22, %v644_v38  ;;  %v559_v55 = vadd.f32 %v527_v57, %v457_v51  ;;  %v729_v42 = vmul.f32 %v2146_v14, %v1928_v6  ;;  %v831_v27 = vmul.f32 %v1936_v10, %v2245_v7  ;;  %v2287_v38 = vld [vmem:[%s1913_s28 + $0x6a] sm:$0xff] }
  0x3b   : > { %v932_v30 = vmul.f32 %v1945_v15, %v2248_v36  ;;  %v341_v31 = vadd.f32 %v309_v63, %v240_v60  ;;  %v512_v28 = vmul.f32 %v2161_v41, %v1918_v4  ;;  %v1064_v46 = vadd.f32 %v1032_v17, %v963_v0 }
  0x3c   : > { %v847_v9 = vadd.f32 %v815_v44, %v745_v19  ;;  %v660_v59 = vadd.f32 %v628_v58, %v559_v55  ;;  %v256_v18 = vmul.f32 %v2071_v35, %v1898_v1  ;;  %v613_v37 = vmul.f32 %v2173_v43, %v1923_v5 }
  0x3d   : > { %v442_v56 = vadd.f32 %v410_v24, %v341_v31  ;;  %v325_v20 = vmul.f32 %v2083_v8, %v1903_v2  ;;  %v426_v22 = vmul.f32 %v2104_v29, %v1908_v3  ;;  %1808 = vmatmul.mubr.msk.f32.gmra.mrb[2].mxu1 %vm1085_vm1, %v1064_v46  ;;  %v1033_v35 = vmul.f32 %v1950_v16, %v2259_v12 }
  0x3e   : > { %v948_v48 = vadd.f32 %v916_v52, %v847_v9  ;;  %v761_v57 = vadd.f32 %v729_v42, %v660_v59  ;;  %v714_v25 = vmul.f32 %v2176_v50, %v1928_v6  ;;  %v816_v8 = vmul.f32 %v1936_v10, %v2273_v26  ;;  %v2301_v42 = vld [vmem:[%s1913_s28 + $0x128] sm:$0xff] }
  0x3f   : > { %v544_v49 = vadd.f32 %v512_v28, %v442_v56  ;;  %v357_v40 = vadd.f32 %v325_v20, %v256_v18  ;;  %v528_v29 = vmul.f32 %v2189_v33, %v1918_v4  ;;  %v629_v58 = vmul.f32 %v2200_v11, %v1923_v5  ;;  %v2312_v59 = vld [vmem:[%s1913_s28 + $0x129] sm:$0xff] }
  0x40   : > { %v1049_v17 = vadd.f32 %v1017_v54, %v948_v48  ;;  %v863_v44 = vadd.f32 %v831_v27, %v761_v57  ;;  %v241_v60 = vmul.f32 %v2093_v21, %v1898_v1  ;;  %v310_v52 = vmul.f32 %v2107_v45, %v1903_v2 }
  0x41   : > { %v645_v47 = vadd.f32 %v613_v37, %v544_v49  ;;  %v458_v51 = vadd.f32 %v426_v22, %v357_v40  ;;  %v411_v54 = vmul.f32 %v2119_v62, %v1908_v3  ;;  %v917_v24 = vmul.f32 %v1945_v15, %v2284_v32 }
  0x42   : > { %1786 = vmatprep.mubr.msk.f32.mxu0 %vm1085_vm1, %v1049_v17  ;;  %v964_v63 = vadd.f32 %v932_v30, %v863_v44  ;;  %v1018_v21 = vmul.f32 %v1950_v16, %v2287_v38  ;;  %v730_v0 = vmul.f32 %v2214_v34, %v1928_v6  ;;  %v342_v45 = vadd.f32 %v310_v52, %v241_v60  ;;  %v2340_v60 = vld [vmem:[%s1913_s28 + $0x79] sm:$0xff] }
  0x43   : > { %v746_v19 = vadd.f32 %v714_v25, %v645_v47  ;;  %v560_v55 = vadd.f32 %v528_v29, %v458_v51  ;;  %v513_v62 = vmul.f32 %v2217_v23, %v1918_v4  ;;  %v832_v30 = vmul.f32 %v1936_v10, %v2301_v42  ;;  %v2329_v25 = vld [vmem:[%s1913_s28 + $0x78] sm:$0xff] }
  0x44   : > { %v1065_v27 = vadd.f32 %v1033_v35, %v964_v63  ;;  %v614_v31 = vmul.f32 %v2228_v61, %v1923_v5  ;;  %v257_v28 = vmul.f32 %v2133_v53, %v1898_v1  ;;  %v443_v18 = vadd.f32 %v411_v54, %v342_v45  ;;  %v2326_v35 = vld [vmem:[%s1913_s28 + $0x12a] sm:$0xff]  ;;  %v2343_v47 = vld [vmem:[%s1913_s28 + $0x7a] sm:$0xff] }
  0x45   : > { %v848_v46 = vadd.f32 %v816_v8, %v746_v19  ;;  %v661_v9 = vadd.f32 %v629_v58, %v560_v55  ;;  %v326_v56 = vmul.f32 %v2143_v13, %v1903_v2  ;;  %v933_v37 = vmul.f32 %v1945_v15, %v2312_v59  ;;  %v2357_v55 = vld [vmem:[%s1913_s28 + $0x138] sm:$0xff] }
  0x46   : > { %1810 = vmatprep.mubr.msk.f32.mxu1 %vm1085_vm1, %v1065_v27  ;;  %v715_v20 = vmul.f32 %v2231_v39, %v1928_v6  ;;  %v427_v53 = vmul.f32 %v2146_v14, %v1908_v3  ;;  %v529_v22 = vmul.f32 %v2245_v7, %v1918_v4  ;;  %v545_v13 = vadd.f32 %v513_v62, %v443_v18  ;;  %v2360_v45 = vld [vmem:[%s1913_s28 + $0x139] sm:$0xff] }
  0x47   : > { %v949_v48 = vadd.f32 %v917_v24, %v848_v46  ;;  %v762_v57 = vadd.f32 %v730_v0, %v661_v9  ;;  %v358_v49 = vadd.f32 %v326_v56, %v257_v28  ;;  %v1034_v8 = vmul.f32 %v1950_v16, %v2326_v35  ;;  %v2371_v9 = vld [vmem:[%s1913_s28 + $0x13a] sm:$0xff] }
  0x48   : > { %v817_v40 = vmul.f32 %v1936_v10, %v2329_v25  ;;  %v630_v14 = vmul.f32 %v2248_v36, %v1923_v5  ;;  %v242_v29 = vmul.f32 %v2161_v41, %v1898_v1  ;;  %v646_v58 = vadd.f32 %v614_v31, %v545_v13 }
  0x49   : > { %v1050_v17 = vadd.f32 %v1018_v21, %v949_v48  ;;  %v864_v44 = vadd.f32 %v832_v30, %v762_v57  ;;  %v459_v51 = vadd.f32 %v427_v53, %v358_v49  ;;  %v918_v52 = vmul.f32 %v1945_v15, %v2340_v60  ;;  %v2385_v57 = vld [vmem:[%s1913_s28 + $0x80] sm:$0xff] }
  0x4a   : > { %v1019_v54 = vmul.f32 %v1950_v16, %v2343_v47  ;;  %v311_v63 = vmul.f32 %v2173_v43, %v1903_v2  ;;  %v412_v41 = vmul.f32 %v2176_v50, %v1908_v3  ;;  %v747_v21 = vadd.f32 %v715_v20, %v646_v58  ;;  %v2399_v58 = vld [vmem:[%s1913_s28 + $0x82] sm:$0xff] }
  0x4b   : > { %1787 = vmatmul.mubr.msk.f32.gmra.mrb[4].mxu0 %vm1085_vm1, %v1050_v17  ;;  %v965_v24 = vadd.f32 %v933_v37, %v864_v44  ;;  %v561_v0 = vadd.f32 %v529_v22, %v459_v51  ;;  %v731_v19 = vmul.f32 %v2259_v12, %v1928_v6  ;;  %v833_v62 = vmul.f32 %v1936_v10, %v2357_v55  ;;  %v2396_v44 = vld [vmem:[%s1913_s28 + $0x81] sm:$0xff] }
  0x4c   : > { %v934_v43 = vmul.f32 %v1945_v15, %v2360_v45  ;;  %v343_v50 = vadd.f32 %v311_v63, %v242_v29  ;;  %v514_v27 = vmul.f32 %v2273_v26, %v1918_v4  ;;  %v849_v31 = vadd.f32 %v817_v40, %v747_v21 }
  0x4d   : > { %v1066_v30 = vadd.f32 %v1034_v8, %v965_v24  ;;  %v662_v28 = vadd.f32 %v630_v14, %v561_v0  ;;  %v258_v46 = vmul.f32 %v2189_v33, %v1898_v1  ;;  %v615_v56 = vmul.f32 %v2284_v32, %v1923_v5 }
  0x4e   : > { %v444_v18 = vadd.f32 %v412_v41, %v343_v50  ;;  %v327_v37 = vmul.f32 %v2200_v11, %v1903_v2  ;;  %v428_v20 = vmul.f32 %v2214_v34, %v1908_v3  ;;  %v950_v53 = vadd.f32 %v918_v52, %v849_v31 }
  0x4f   : > { %1811 = vmatmul.mubr.msk.f32.gmra.mrb[4].mxu1 %vm1085_vm1, %v1066_v30  ;;  %v763_v22 = vadd.f32 %v731_v19, %v662_v28  ;;  %v1035_v33 = vmul.f32 %v1950_v16, %v2371_v9  ;;  %v716_v48 = vmul.f32 %v2287_v38, %v1928_v6  ;;  %v818_v11 = vmul.f32 %v1936_v10, %v2385_v57  ;;  %v2413_v19 = vld [vmem:[%s1913_s28 + $0x140] sm:$0xff] }
  0x50   : > { %v546_v13 = vadd.f32 %v514_v27, %v444_v18  ;;  %v359_v49 = vadd.f32 %v327_v37, %v258_v46  ;;  %v530_v34 = vmul.f32 %v2301_v42, %v1918_v4  ;;  %v1051_v8 = vadd.f32 %v1019_v54, %v950_v53  ;;  %v2424_v28 = vld [vmem:[%s1913_s28 + $0x141] sm:$0xff] }
  0x51   : > { %v865_v40 = vadd.f32 %v833_v62, %v763_v22  ;;  %v631_v14 = vmul.f32 %v2312_v59, %v1923_v5  ;;  %v243_v29 = vmul.f32 %v2217_v23, %v1898_v1  ;;  %v312_v52 = vmul.f32 %v2228_v61, %v1903_v2 }
  0x52   : > { %v647_v17 = vadd.f32 %v615_v56, %v546_v13  ;;  %v460_v51 = vadd.f32 %v428_v20, %v359_v49  ;;  %v413_v54 = vmul.f32 %v2231_v39, %v1908_v3  ;;  %1789 = vmatprep.mubr.msk.f32.mxu0 %vm1085_vm1, %v1051_v8  ;;  %v919_v41 = vmul.f32 %v1945_v15, %v2396_v44 }
  0x53   : > { %v966_v63 = vadd.f32 %v934_v43, %v865_v40  ;;  %v1020_v23 = vmul.f32 %v1950_v16, %v2399_v58  ;;  %v732_v24 = vmul.f32 %v2326_v35, %v1928_v6  ;;  %v344_v61 = vadd.f32 %v312_v52, %v243_v29  ;;  %v2452_v29 = vld [vmem:[%s1913_s28 + $0x91] sm:$0xff] }
  0x54   : > { %v748_v21 = vadd.f32 %v716_v48, %v647_v17  ;;  %v562_v0 = vadd.f32 %v530_v34, %v460_v51  ;;  %v515_v39 = vmul.f32 %v2329_v25, %v1918_v4  ;;  %v834_v43 = vmul.f32 %v1936_v10, %v2413_v19  ;;  %v2441_v48 = vld [vmem:[%s1913_s28 + $0x90] sm:$0xff] }
  0x55   : > { %v1067_v62 = vadd.f32 %v1035_v33, %v966_v63  ;;  %v616_v50 = vmul.f32 %v2340_v60, %v1923_v5  ;;  %v259_v27 = vmul.f32 %v2245_v7, %v1898_v1  ;;  %v445_v46 = vadd.f32 %v413_v54, %v344_v61  ;;  %v2438_v33 = vld [vmem:[%s1913_s28 + $0x142] sm:$0xff]  ;;  %v2455_v17 = vld [vmem:[%s1913_s28 + $0x92] sm:$0xff] }
  0x56   : > { %v850_v30 = vadd.f32 %v818_v11, %v748_v21  ;;  %v663_v31 = vadd.f32 %v631_v14, %v562_v0  ;;  %v328_v18 = vmul.f32 %v2248_v36, %v1903_v2  ;;  %v935_v56 = vmul.f32 %v1945_v15, %v2424_v28  ;;  %v2469_v0 = vld [vmem:[%s1913_s28 + $0x150] sm:$0xff] }
  0x57   : > { %1813 = vmatprep.mubr.msk.f32.mxu1 %vm1085_vm1, %v1067_v62  ;;  %v717_v37 = vmul.f32 %v2343_v47, %v1928_v6  ;;  %v429_v7 = vmul.f32 %v2259_v12, %v1908_v3  ;;  %v531_v20 = vmul.f32 %v2357_v55, %v1918_v4  ;;  %v547_v36 = vadd.f32 %v515_v39, %v445_v46  ;;  %v2472_v61 = vld [vmem:[%s1913_s28 + $0x151] sm:$0xff] }
  0x58   : > { %v951_v53 = vadd.f32 %v919_v41, %v850_v30  ;;  %v764_v22 = vadd.f32 %v732_v24, %v663_v31  ;;  %v360_v13 = vadd.f32 %v328_v18, %v259_v27  ;;  %v1036_v11 = vmul.f32 %v1950_v16, %v2438_v33  ;;  %v2483_v31 = vld [vmem:[%s1913_s28 + $0x152] sm:$0xff] }
  0x59   : > { %v819_v49 = vmul.f32 %v1936_v10, %v2441_v48  ;;  %v632_v12 = vmul.f32 %v2360_v45, %v1923_v5  ;;  %v244_v34 = vmul.f32 %v2273_v26, %v1898_v1  ;;  %v648_v14 = vadd.f32 %v616_v50, %v547_v36 }
  0x5a   : > { %v1052_v8 = vadd.f32 %v1020_v23, %v951_v53  ;;  %v866_v40 = vadd.f32 %v834_v43, %v764_v22  ;;  %v461_v51 = vadd.f32 %v429_v7, %v360_v13  ;;  %v920_v52 = vmul.f32 %v1945_v15, %v2452_v29  ;;  %v2497_v22 = vld [vmem:[%s1913_s28 + $0x98] sm:$0xff] }
  0x5b   : > { %v1021_v54 = vmul.f32 %v1950_v16, %v2455_v17  ;;  %v313_v63 = vmul.f32 %v2284_v32, %v1903_v2  ;;  %v414_v26 = vmul.f32 %v2287_v38, %v1908_v3  ;;  %v749_v23 = vadd.f32 %v717_v37, %v648_v14  ;;  %v2511_v14 = vld [vmem:[%s1913_s28 + $0x9a] sm:$0xff] }
  0x5c   : > { %1790 = vmatmul.mubr.msk.f32.gmra.mrb[6].mxu0 %vm1085_vm1, %v1052_v8  ;;  %v967_v41 = vadd.f32 %v935_v56, %v866_v40  ;;  %v563_v24 = vadd.f32 %v531_v20, %v461_v51  ;;  %v733_v21 = vmul.f32 %v2371_v9, %v1928_v6  ;;  %v835_v39 = vmul.f32 %v1936_v10, %v2469_v0  ;;  %v2508_v40 = vld [vmem:[%s1913_s28 + $0x99] sm:$0xff] }
  0x5d   : > { %v936_v32 = vmul.f32 %v1945_v15, %v2472_v61  ;;  %v345_v38 = vadd.f32 %v313_v63, %v244_v34  ;;  %v516_v62 = vmul.f32 %v2385_v57, %v1918_v4  ;;  %v851_v50 = vadd.f32 %v819_v49, %v749_v23 }
  0x5e   : > { %v1068_v43 = vadd.f32 %v1036_v11, %v967_v41  ;;  %v664_v27 = vadd.f32 %v632_v12, %v563_v24  ;;  %v260_v30 = vmul.f32 %v2301_v42, %v1898_v1  ;;  %v617_v18 = vmul.f32 %v2396_v44, %v1923_v5 }
  0x5f   : > { %v446_v46 = vadd.f32 %v414_v26, %v345_v38  ;;  %v329_v56 = vmul.f32 %v2312_v59, %v1903_v2  ;;  %v430_v37 = vmul.f32 %v2326_v35, %v1908_v3  ;;  %v952_v7 = vadd.f32 %v920_v52, %v851_v50 }
  0x60   : > { %1814 = vmatmul.mubr.msk.f32.gmra.mrb[6].mxu1 %vm1085_vm1, %v1068_v43  ;;  %v765_v20 = vadd.f32 %v733_v21, %v664_v27  ;;  %v1037_v42 = vmul.f32 %v1950_v16, %v2483_v31  ;;  %v718_v53 = vmul.f32 %v2399_v58, %v1928_v6  ;;  %v820_v59 = vmul.f32 %v1936_v10, %v2497_v22  ;;  %v2525_v21 = vld [vmem:[%s1913_s28 + $0x158] sm:$0xff] }
  0x61   : > { %v548_v36 = vadd.f32 %v516_v62, %v446_v46  ;;  %v361_v13 = vadd.f32 %v329_v56, %v260_v30  ;;  %v532_v35 = vmul.f32 %v2413_v19, %v1918_v4  ;;  %v1053_v11 = vadd.f32 %v1021_v54, %v952_v7  ;;  %v2536_v27 = vld [vmem:[%s1913_s28 + $0x159] sm:$0xff] }
  0x62   : > { %v867_v49 = vadd.f32 %v835_v39, %v765_v20  ;;  %v633_v12 = vmul.f32 %v2424_v28, %v1923_v5  ;;  %v245_v34 = vmul.f32 %v2329_v25, %v1898_v1  ;;  %v314_v52 = vmul.f32 %v2340_v60, %v1903_v2 }
  0x63   : > { %v649_v8 = vadd.f32 %v617_v18, %v548_v36  ;;  %v462_v51 = vadd.f32 %v430_v37, %v361_v13  ;;  %v415_v54 = vmul.f32 %v2343_v47, %v1908_v3  ;;  %1792 = vmatprep.mubr.msk.f32.mxu0 %vm1085_vm1, %v1053_v11  ;;  %v921_v26 = vmul.f32 %v1945_v15, %v2508_v40 }
  0x64   : > { %v968_v63 = vadd.f32 %v936_v32, %v867_v49  ;;  %v1022_v25 = vmul.f32 %v1950_v16, %v2511_v14  ;;  %v734_v41 = vmul.f32 %v2438_v33, %v1928_v6  ;;  %v346_v60 = vadd.f32 %v314_v52, %v245_v34  ;;  %v2564_v34 = vld [vmem:[%s1913_s28 + $0xa9] sm:$0xff] }
  0x65   : > { %v750_v23 = vadd.f32 %v718_v53, %v649_v8  ;;  %v564_v24 = vadd.f32 %v532_v35, %v462_v51  ;;  %v517_v47 = vmul.f32 %v2441_v48, %v1918_v4  ;;  %v836_v32 = vmul.f32 %v1936_v10, %v2525_v21  ;;  %v2553_v53 = vld [vmem:[%s1913_s28 + $0xa8] sm:$0xff] }
  0x66   : > { %v1069_v39 = vadd.f32 %v1037_v42, %v968_v63  ;;  %v618_v38 = vmul.f32 %v2452_v29, %v1923_v5  ;;  %v261_v62 = vmul.f32 %v2357_v55, %v1898_v1  ;;  %v447_v30 = vadd.f32 %v415_v54, %v346_v60  ;;  %v2550_v42 = vld [vmem:[%s1913_s28 + $0x15a] sm:$0xff]  ;;  %v2567_v8 = vld [vmem:[%s1913_s28 + $0xaa] sm:$0xff] }
  0x67   : > { %v852_v43 = vadd.f32 %v820_v59, %v750_v23  ;;  %v665_v50 = vadd.f32 %v633_v12, %v564_v24  ;;  %v330_v46 = vmul.f32 %v2360_v45, %v1903_v2  ;;  %v937_v18 = vmul.f32 %v1945_v15, %v2536_v27  ;;  %v2581_v24 = vld [vmem:[%s1913_s28 + $0x168] sm:$0xff] }
  0x68   : > { %1816 = vmatprep.mubr.msk.f32.mxu1 %vm1085_vm1, %v1069_v39  ;;  %v719_v56 = vmul.f32 %v2455_v17, %v1928_v6  ;;  %v431_v55 = vmul.f32 %v2371_v9, %v1908_v3  ;;  %v533_v37 = vmul.f32 %v2469_v0, %v1918_v4  ;;  %v549_v45 = vadd.f32 %v517_v47, %v447_v30  ;;  %v2584_v60 = vld [vmem:[%s1913_s28 + $0x169] sm:$0xff] }
  0x69   : > { %v953_v7 = vadd.f32 %v921_v26, %v852_v43  ;;  %v766_v20 = vadd.f32 %v734_v41, %v665_v50  ;;  %v362_v36 = vadd.f32 %v330_v46, %v261_v62  ;;  %v1038_v59 = vmul.f32 %v1950_v16, %v2550_v42  ;;  %v2595_v50 = vld [vmem:[%s1913_s28 + $0x16a] sm:$0xff] }
  0x6a   : > { %v821_v13 = vmul.f32 %v1936_v10, %v2553_v53  ;;  %v634_v9 = vmul.f32 %v2472_v61, %v1923_v5  ;;  %v246_v35 = vmul.f32 %v2385_v57, %v1898_v1  ;;  %v650_v12 = vadd.f32 %v618_v38, %v549_v45 }
  0x6b   : > { %v1054_v11 = vadd.f32 %v1022_v25, %v953_v7  ;;  %v868_v49 = vadd.f32 %v836_v32, %v766_v20  ;;  %v463_v51 = vadd.f32 %v431_v55, %v362_v36  ;;  %v922_v52 = vmul.f32 %v1945_v15, %v2564_v34  ;;  %v2609_v20 = vld [vmem:[%s1913_s28 + $0xb0] sm:$0xff] }
  0x6c   : > { %v1023_v54 = vmul.f32 %v1950_v16, %v2567_v8  ;;  %v315_v63 = vmul.f32 %v2396_v44, %v1903_v2  ;;  %v416_v57 = vmul.f32 %v2399_v58, %v1908_v3  ;;  %v751_v25 = vadd.f32 %v719_v56, %v650_v12 }
  0x6d   : > { %1793 = vmatmul.mubr.msk.f32.gmra.mrb[8].mxu0 %vm1085_vm1, %v1054_v11  ;;  %v969_v26 = vadd.f32 %v937_v18, %v868_v49  ;;  %v565_v41 = vadd.f32 %v533_v37, %v463_v51  ;;  %v735_v23 = vmul.f32 %v2483_v31, %v1928_v6  ;;  %v837_v47 = vmul.f32 %v1936_v10, %v2581_v24 }
  0x6e   : > { %v938_v44 = vmul.f32 %v1945_v15, %v2584_v60  ;;  %v347_v58 = vadd.f32 %v315_v63, %v246_v35  ;;  %v518_v39 = vmul.f32 %v2497_v22, %v1918_v4  ;;  %v853_v38 = vadd.f32 %v821_v13, %v751_v25  ;;  %v2623_v35 = vld [vmem:[%s1913_s28 + $0xb2] sm:$0xff] }
  0x6f   : > { %v1070_v32 = vadd.f32 %v1038_v59, %v969_v26  ;;  %v666_v62 = vadd.f32 %v634_v9, %v565_v41  ;;  %v262_v43 = vmul.f32 %v2413_v19, %v1898_v1  ;;  %v619_v46 = vmul.f32 %v2508_v40, %v1923_v5  ;;  %v2664_v26 = vld [vmem:[%s2980_s1 + $0x6] ss:$0 sm:$0xff]  ;;  %v2671_v41 = vld [vmem:[%s2980_s1 + $0x4] ss:$0 sm:$0xff] }
  0x70   : > { %v448_v30 = vadd.f32 %v416_v57, %v347_v58  ;;  %v331_v18 = vmul.f32 %v2424_v28, %v1903_v2  ;;  %v432_v56 = vmul.f32 %v2438_v33, %v1908_v3  ;;  %v954_v55 = vadd.f32 %v922_v52, %v853_v38 }
  0x71   : > { %1817 = vmatmul.mubr.msk.f32.gmra.mrb[8].mxu1 %vm1085_vm1, %v1070_v32  ;;  %v767_v37 = vadd.f32 %v735_v23, %v666_v62  ;;  %v1039_v19 = vmul.f32 %v1950_v16, %v2595_v50  ;;  %v720_v7 = vmul.f32 %v2511_v14, %v1928_v6  ;;  %v822_v2 = vmul.f32 %v1936_v10, %v2609_v20  ;;  %v2620_v6 = vld [vmem:[%s1913_s28 + $0xb1] sm:$0xff]  ;;  %v2628_v10 = vld [vmem:[%s2980_s1 + $0x1] ss:$0 sm:$0xff] }
  0x72   : > { %v550_v45 = vadd.f32 %v518_v39, %v448_v30  ;;  %v363_v28 = vadd.f32 %v331_v18, %v262_v43  ;;  %v534_v3 = vmul.f32 %v2525_v21, %v1918_v4  ;;  %v1055_v33 = vadd.f32 %v1023_v54, %v954_v55  ;;  %v2652_v54 = vld [vmem:[%s1913_s28 + $0x170] sm:$0xff]  ;;  %v2691_v43 = vld [vmem:[%s2980_s1 + $0x7] ss:$0 sm:$0xff] }
  0x73   : > { %v869_v36 = vadd.f32 %v837_v47, %v767_v37  ;;  %v635_v59 = vmul.f32 %v2536_v27, %v1923_v5  ;;  %v247_v13 = vmul.f32 %v2441_v48, %v1898_v1  ;;  %v316_v4 = vmul.f32 %v2628_v10, %v2452_v29  ;;  %v2635_v5 = vld [vmem:[%s2980_s1 + $0x2] ss:$0 sm:$0xff]  ;;  %v2647_v29 = vld [vmem:[%s2980_s1 + $0x5] ss:$0 sm:$0xff]  ;;  %v2678_v47 = vld [vmem:[%s2980_s1] ss:$0 sm:$0xff] }
  0x74   : > { %v651_v9 = vadd.f32 %v619_v46, %v550_v45  ;;  %v464_v11 = vadd.f32 %v432_v56, %v363_v28  ;;  %v417_v1 = vmul.f32 %v2635_v5, %v2455_v17  ;;  %1795 = vmatprep.mubr.msk.f32.mxu0 %vm1085_vm1, %v1055_v33  ;;  %v923_v49 = vmul.f32 %v1945_v15, %v2620_v6  ;;  %v2657_v15 = vld [vmem:[%s2980_s1 + $0x3] ss:$0 sm:$0xff]  ;;  %v2683_v32 = vld [vmem:[%s1913_s28 + $0x171] sm:$0xff]  ;;  %v2710_v45 = vld [vmem:[%s2980_s1 + $0x8] ss:$0 sm:$0xff] }
  0x75   : > { %v970_v48 = vadd.f32 %v938_v44, %v869_v36  ;;  %v1024_v12 = vmul.f32 %v1950_v16, %v2623_v35  ;;  %v736_v51 = vmul.f32 %v2647_v29, %v2550_v42  ;;  %v348_v63 = vadd.f32 %v316_v4, %v247_v13  ;;  %v2702_v55 = vld [vmem:[%s1913_s28 + $0x172] sm:$0xff]  ;;  %v1654_v13 = vld [vmem:[%s1913_s28 + $0xc1] sm:$0xff] }
  0x76   : > { %v752_v52 = vadd.f32 %v720_v7, %v651_v9  ;;  %v566_v17 = vadd.f32 %v534_v3, %v464_v11  ;;  %v519_v16 = vmul.f32 %v2657_v15, %v2553_v53  ;;  %v838_v25 = vmul.f32 %v2664_v26, %v2652_v54  ;;  %v2722_v9 = vld [vmem:[%s1913_s28 + $0xc2] sm:$0xff] }
  0x77   : > { %v1071_v57 = vadd.f32 %v1039_v19, %v970_v48  ;;  %v620_v23 = vmul.f32 %v2671_v41, %v2564_v34  ;;  %v263_v44 = vmul.f32 %v2678_v47, %v2469_v0  ;;  %v449_v38 = vadd.f32 %v417_v1, %v348_v63  ;;  %v2705_v19 = vld [vmem:[%s1913_s28 + $0xc0] sm:$0xff] }
  0x78   : > { %v854_v58 = vadd.f32 %v822_v2, %v752_v52  ;;  %v667_v39 = vadd.f32 %v635_v59, %v566_v17  ;;  %v332_v62 = vmul.f32 %v2628_v10, %v2472_v61  ;;  %v939_v30 = vmul.f32 %v2691_v43, %v2683_v32  ;;  %v1637_v17 = vld [vmem:[%s1913_s28 + $0x180] sm:$0xff] }
  0x79   : > { %1819 = vmatprep.mubr.msk.f32.mxu1 %vm1085_vm1, %v1071_v57  ;;  %v721_v0 = vmul.f32 %v2647_v29, %v2567_v8  ;;  %v433_v46 = vmul.f32 %v2635_v5, %v2483_v31  ;;  %v535_v61 = vmul.f32 %v2657_v15, %v2581_v24  ;;  %v551_v37 = vadd.f32 %v519_v16, %v449_v38  ;;  %v2736_v63 = vld [vmem:[%s1913_s28 + $0x181] sm:$0xff] }
  0x7a   : > { %v955_v18 = vadd.f32 %v923_v49, %v854_v58  ;;  %v768_v56 = vadd.f32 %v736_v51, %v667_v39  ;;  %v364_v7 = vadd.f32 %v332_v62, %v263_v44  ;;  %v1040_v31 = vmul.f32 %v2710_v45, %v2702_v55  ;;  %v2746_v39 = vld [vmem:[%s1913_s28 + $0x182] sm:$0xff] }
  0x7b   : > { %v823_v2 = vmul.f32 %v2664_v26, %v2705_v19  ;;  %v636_v28 = vmul.f32 %v2671_v41, %v2584_v60  ;;  %v248_v3 = vmul.f32 %v2678_v47, %v2497_v22  ;;  %v652_v59 = vadd.f32 %v620_v23, %v551_v37 }
  0x7c   : > { %v1056_v33 = vadd.f32 %v1024_v12, %v955_v18  ;;  %v870_v36 = vadd.f32 %v838_v25, %v768_v56  ;;  %v465_v11 = vadd.f32 %v433_v46, %v364_v7  ;;  %v924_v4 = vmul.f32 %v2691_v43, %v1654_v13  ;;  %v2760_v56 = vld [vmem:[%s1913_s28 + $0xc8] sm:$0xff] }
  0x7d   : > { %v1025_v1 = vmul.f32 %v2710_v45, %v2722_v9  ;;  %v317_v48 = vmul.f32 %v2628_v10, %v2508_v40  ;;  %v418_v22 = vmul.f32 %v2635_v5, %v2511_v14  ;;  %v753_v12 = vadd.f32 %v721_v0, %v652_v59  ;;  %v2774_v59 = vld [vmem:[%s1913_s28 + $0xca] sm:$0xff] }
  0x7e   : > { %1796 = vmatmul.mubr.msk.f32.gmra.mrb[10].mxu0 %vm1085_vm1, %v1056_v33  ;;  %v971_v49 = vadd.f32 %v939_v30, %v870_v36  ;;  %v567_v51 = vadd.f32 %v535_v61, %v465_v11  ;;  %v737_v52 = vmul.f32 %v2647_v29, %v2595_v50  ;;  %v839_v16 = vmul.f32 %v2664_v26, %v1637_v17  ;;  %v2771_v36 = vld [vmem:[%s1913_s28 + $0xc9] sm:$0xff] }
  0x7f   : > { %v940_v40 = vmul.f32 %v2691_v43, %v2736_v63  ;;  %v349_v57 = vadd.f32 %v317_v48, %v248_v3  ;;  %v520_v14 = vmul.f32 %v2657_v15, %v2609_v20  ;;  %v855_v23 = vadd.f32 %v823_v2, %v753_v12 }
  0x80   : > { %v1072_v25 = vadd.f32 %v1040_v31, %v971_v49  ;;  %v668_v44 = vadd.f32 %v636_v28, %v567_v51  ;;  %v264_v58 = vmul.f32 %v2678_v47, %v2525_v21  ;;  %v621_v62 = vmul.f32 %v2671_v41, %v2620_v6 }
  0x81   : > { %v450_v38 = vadd.f32 %v418_v22, %v349_v57  ;;  %v333_v30 = vmul.f32 %v2628_v10, %v2536_v27  ;;  %v434_v0 = vmul.f32 %v2635_v5, %v2550_v42  ;;  %v956_v46 = vadd.f32 %v924_v4, %v855_v23 }
  0x82   : > { %1820 = vmatmul.mubr.msk.f32.gmra.mrb[10].mxu1 %vm1085_vm1, %v1072_v25  ;;  %v769_v61 = vadd.f32 %v737_v52, %v668_v44  ;;  %v1041_v21 = vmul.f32 %v2710_v45, %v2746_v39  ;;  %v722_v18 = vmul.f32 %v2647_v29, %v2623_v35  ;;  %v824_v27 = vmul.f32 %v2664_v26, %v2760_v56  ;;  %v2798_v44 = vld [vmem:[%s1913_s28 + $0x189] sm:$0xff] }
  0x83   : > { %v552_v37 = vadd.f32 %v520_v14, %v450_v38  ;;  %v365_v7 = vadd.f32 %v333_v30, %v264_v58  ;;  %v536_v42 = vmul.f32 %v2657_v15, %v2652_v54  ;;  %v1057_v31 = vadd.f32 %v1025_v1, %v956_v46  ;;  %v1623_v38 = vld [vmem:[%s1913_s28 + $0xd8] sm:$0xff] }
  0x84   : > { %v871_v2 = vadd.f32 %v839_v16, %v769_v61  ;;  %v637_v28 = vmul.f32 %v2671_v41, %v2683_v32  ;;  %v249_v3 = vmul.f32 %v2678_v47, %v2553_v53  ;;  %v318_v4 = vmul.f32 %v2628_v10, %v2564_v34  ;;  %v2788_v34 = vld [vmem:[%s1913_s28 + $0x188] sm:$0xff] }
  0x85   : > { %v653_v33 = vadd.f32 %v621_v62, %v552_v37  ;;  %v466_v11 = vadd.f32 %v434_v0, %v365_v7  ;;  %v419_v1 = vmul.f32 %v2635_v5, %v2567_v8  ;;  %1798 = vmatprep.mubr.msk.f32.mxu0 %vm1085_vm1, %v1057_v31  ;;  %v925_v22 = vmul.f32 %v2691_v43, %v2771_v36  ;;  %v1704_v61 = vld [vmem:[%s1913_s28 + $0x18a] sm:$0xff]  ;;  %v1689_v31 = vld [vmem:[%s1913_s28 + $0xda] sm:$0xff] }
  0x86   : > { %v972_v48 = vadd.f32 %v940_v40, %v871_v2  ;;  %v1026_v53 = vmul.f32 %v2710_v45, %v2774_v59  ;;  %v738_v49 = vmul.f32 %v2647_v29, %v2702_v55  ;;  %v350_v52 = vadd.f32 %v318_v4, %v249_v3 }
  0x87   : > { %v754_v12 = vadd.f32 %v722_v18, %v653_v33  ;;  %v568_v51 = vadd.f32 %v536_v42, %v466_v11  ;;  %v521_v8 = vmul.f32 %v2657_v15, %v2705_v19  ;;  %v840_v40 = vmul.f32 %v2664_v26, %v2788_v34 }
  0x88   : > { %v1073_v16 = vadd.f32 %v1041_v21, %v972_v48  ;;  %v622_v57 = vmul.f32 %v2671_v41, %v1654_v13  ;;  %v265_v14 = vmul.f32 %v2678_v47, %v2581_v24  ;;  %v451_v58 = vadd.f32 %v419_v1, %v350_v52 }
  0x89   : > { %v856_v25 = vadd.f32 %v824_v27, %v754_v12  ;;  %v669_v23 = vadd.f32 %v637_v28, %v568_v51  ;;  %v334_v19 = vmul.f32 %v2628_v10, %v2584_v60  ;;  %v941_v62 = vmul.f32 %v2691_v43, %v2798_v44  ;;  %v1656_v60 = vld [vmem:[%s1913_s28 + $0xd9] sm:$0xff] }
  0x8a   : > { %1822 = vmatprep.mubr.msk.f32.mxu1 %vm1085_vm1, %v1073_v16  ;;  %v723_v13 = vmul.f32 %v2647_v29, %v2722_v9  ;;  %v435_v24 = vmul.f32 %v2635_v5, %v2595_v50  ;;  %v537_v30 = vmul.f32 %v2657_v15, %v1637_v17  ;;  %v553_v21 = vadd.f32 %v521_v8, %v451_v58  ;;  %v1639_v28 = vld [vmem:[%s1913_s28 + $0x198] sm:$0xff] }
  0x8b   : > { %v957_v0 = vadd.f32 %v925_v22, %v856_v25  ;;  %v770_v46 = vadd.f32 %v738_v49, %v669_v23  ;;  %v366_v18 = vadd.f32 %v334_v19, %v265_v14  ;;  %v1042_v37 = vmul.f32 %v2710_v45, %v1704_v61  ;;  %v1705_v8 = vld [vmem:[%s1913_s28 + $0x19a] sm:$0xff] }
  0x8c   : > { %v825_v27 = vmul.f32 %v2664_v26, %v1623_v38  ;;  %v638_v9 = vmul.f32 %v2671_v41, %v2736_v63  ;;  %v250_v7 = vmul.f32 %v2678_v47, %v2609_v20  ;;  %v654_v42 = vadd.f32 %v622_v57, %v553_v21 }
  0x8d   : > { %v1058_v50 = vadd.f32 %v1026_v53, %v957_v0  ;;  %v872_v17 = vadd.f32 %v840_v40, %v770_v46  ;;  %v467_v2 = vadd.f32 %v435_v24, %v366_v18  ;;  %v926_v3 = vmul.f32 %v2691_v43, %v1656_v60  ;;  %v1672_v53 = vld [vmem:[%s1913_s28 + $0x199] sm:$0xff]  ;;  %v1690_v24 = vld [vmem:[%s1913_s28 + $0xe2] sm:$0xff] }
  0x8e   : > { %v319_v33 = vmul.f32 %v2628_v10, %v2620_v6  ;;  %v420_v11 = vmul.f32 %v2635_v5, %v2623_v35  ;;  %v755_v20 = vadd.f32 %v723_v13, %v654_v42  ;;  %v739_v1 = vmul.f32 %v2647_v29, %v2746_v39  ;;  %v1673_v60 = vld [vmem:[%s1913_s28 + $0x1a1] sm:$0xff] }
  0x8f   : > { %1799 = vmatmul.mubr.msk.f32.gmra.mrb[12].mxu0 %vm1085_vm1, %v1058_v50  ;;  %v973_v63 = vadd.f32 %v941_v62, %v872_v17  ;;  %v569_v4 = vadd.f32 %v537_v30, %v467_v2  ;;  %v1027_v48 = vmul.f32 %v2710_v45, %v1689_v31  ;;  %v841_v22 = vmul.f32 %v2664_v26, %v1639_v28  ;;  %v1640_v30 = vld [vmem:[%s1913_s28 + $0x1a0] sm:$0xff] }
  0x90   : > { %v351_v49 = vadd.f32 %v319_v33, %v250_v7  ;;  %v522_v6 = vmul.f32 %v2657_v15, %v2760_v56  ;;  %v857_v35 = vadd.f32 %v825_v27, %v755_v20  ;;  %v266_v52 = vmul.f32 %v2678_v47, %v2652_v54  ;;  %v1624_v54 = vld [vmem:[%s1913_s28 + $0xe0] sm:$0xff] }
  0x91   : > { %v1074_v12 = vadd.f32 %v1042_v37, %v973_v63  ;;  %v670_v51 = vadd.f32 %v638_v9, %v569_v4  ;;  %v623_v39 = vmul.f32 %v2671_v41, %v2771_v36  ;;  %v335_v40 = vmul.f32 %v2628_v10, %v2683_v32 }
  0x92   : > { %v452_v16 = vadd.f32 %v420_v11, %v351_v49  ;;  %v436_v57 = vmul.f32 %v2635_v5, %v2702_v55  ;;  %v958_v56 = vadd.f32 %v926_v3, %v857_v35  ;;  %v942_v25 = vmul.f32 %v2691_v43, %v1672_v53  ;;  %v1657_v55 = vld [vmem:[%s1913_s28 + $0xe1] sm:$0xff] }
  0x93   : > { %1823 = vmatmul.mubr.msk.f32.gmra.mrb[12].mxu1 %vm1085_vm1, %v1074_v12  ;;  %v771_v14 = vadd.f32 %v739_v1, %v670_v51  ;;  %v724_v23 = vmul.f32 %v2647_v29, %v2774_v59  ;;  %v367_v36 = vadd.f32 %v335_v40, %v266_v52  ;;  %v538_v10 = vmul.f32 %v2657_v15, %v2788_v34 }
  0x94   : > { %v554_v47 = vadd.f32 %v522_v6, %v452_v16  ;;  %v1059_v32 = vadd.f32 %v1027_v48, %v958_v56  ;;  %v1043_v5 = vmul.f32 %v2710_v45, %v1705_v8  ;;  %v826_v19 = vmul.f32 %v2664_v26, %v1624_v54 }
  0x95   : > { %v873_v58 = vadd.f32 %v841_v22, %v771_v14  ;;  %v468_v62 = vadd.f32 %v436_v57, %v367_v36  ;;  %v639_v13 = vmul.f32 %v2671_v41, %v2798_v44  ;;  %v927_v34 = vmul.f32 %v2691_v43, %v1657_v55  ;;  %v1706_v44 = vld [vmem:[%s1913_s28 + $0x1a2] sm:$0xff] }
  0x96   : > { %v655_v38 = vadd.f32 %v623_v39, %v554_v47  ;;  %1801 = vmatprep.mubr.msk.f32.mxu0 %vm1085_vm1, %v1059_v32  ;;  %v740_v46 = vmul.f32 %v2647_v29, %v1704_v61  ;;  %v1028_v37 = vmul.f32 %v2710_v45, %v1690_v24  ;;  %v842_v41 = vmul.f32 %v2664_v26, %v1640_v30  ;;  %v2873_v26 = vld [vmem:[%s2982_s3] ss:$0 sm:$0xff] }
  0x97   : > { %v974_v59 = vadd.f32 %v942_v25, %v873_v58  ;;  %v570_v0 = vadd.f32 %v538_v10, %v468_v62  ;;  %v943_v50 = vmul.f32 %v2691_v43, %v1673_v60  ;;  %v1044_v29 = vmul.f32 %v2710_v45, %v1706_v44 }
  0x98   : > { %v756_v15 = vadd.f32 %v724_v23, %v655_v38 }
  0x99   : > { %v1075_v21 = vadd.f32 %v1043_v5, %v974_v59  ;;  %v671_v27 = vadd.f32 %v639_v13, %v570_v0 }
  0x9a   : > { %v858_v18 = vadd.f32 %v826_v19, %v756_v15 }
  0x9b   : > { %1825 = vmatprep.mubr.msk.f32.mxu1 %vm1085_vm1, %v1075_v21  ;;  %v772_v7 = vadd.f32 %v740_v46, %v671_v27 }
  0x9c   : > { %v959_v9 = vadd.f32 %v927_v34, %v858_v18 }
  0x9d   : > { %v874_v42 = vadd.f32 %v842_v41, %v772_v7 }
  0x9e   : > { %v1060_v17 = vadd.f32 %v1028_v37, %v959_v9 }
  0x9f   : > { %v975_v61 = vadd.f32 %v943_v50, %v874_v42 }
  0xa0   : > { %1802 = vmatmul.mubr.msk.f32.gmra.mrb[14].mxu0 %vm1085_vm1, %v1060_v17 }
  0xa1   : > { %v1076_v31 = vadd.f32 %v1044_v29, %v975_v61 }
  0xa3   : > { %1826 = vmatmul.mubr.msk.f32.gmra.mrb[14].mxu1 %vm1085_vm1, %v1076_v31 }
  0xfc   : > { %v1782_v43 = vpop.f32.mrb[0].mxu0 }
  0xfd   : > { %v1258_v45 = vadd.f32 %v1782_v43, %v2873_v26  ;;  %v1252_v2 = vpop.f32.mrb[1].mxu0 }
  0xfe   : > { %v1253_v28 = vadd.f32 %v2873_v26, %v1252_v2 }
  0xff   : > { %1413 = vst.msk [vmem:[%s2878_s14 + $0x8] sm:$0xff] %vm1411_vm2, %v1258_v45  ;;  %v1806_v3 = vpop.f32.mrb[0].mxu1 }
 0x100   : > { %v1338_v33 = vadd.f32 %v1806_v3, %v2873_v26  ;;  %1412 = vst.msk [vmem:[%s2878_s14] sm:$0xff] %vm1411_vm2, %v1253_v28  ;;  %v1332_v11 = vpop.f32.mrb[1].mxu1 }
 0x101   : > { %v1333_v63 = vadd.f32 %v2873_v26, %v1332_v11 }
 0x102   : > { %1429 = vst.msk [vmem:[%s2878_s14 + $0x88] sm:$0xff] %vm1411_vm2, %v1338_v33 }
 0x103   : > { %1428 = vst.msk [vmem:[%s2878_s14 + $0x80] sm:$0xff] %vm1411_vm2, %v1333_v63 }
 0x10d   : > { %v1785_v20 = vpop.f32.mrb[2].mxu0 }
 0x10e   : > { %v1268_v4 = vadd.f32 %v1785_v20, %v2873_v26  ;;  %v1262_v1 = vpop.f32.mrb[3].mxu0 }
 0x10f   : > { %v1263_v48 = vadd.f32 %v2873_v26, %v1262_v1 }
 0x110   : > { %1415 = vst.msk [vmem:[%s2878_s14 + $0x18] sm:$0xff] %vm1411_vm2, %v1268_v4  ;;  %v1809_v22 = vpop.f32.mrb[2].mxu1 }
 0x111   : > { %1414 = vst.msk [vmem:[%s2878_s14 + $0x10] sm:$0xff] %vm1411_vm2, %v1263_v48  ;;  %v1348_v53 = vadd.f32 %v1809_v22, %v2873_v26  ;;  %v1342_v49 = vpop.f32.mrb[3].mxu1 }
 0x112   : > { %v1343_v6 = vadd.f32 %v2873_v26, %v1342_v49 }
 0x113   : > { %1431 = vst.msk [vmem:[%s2878_s14 + $0x98] sm:$0xff] %vm1411_vm2, %v1348_v53 }
 0x114   : > { %1430 = vst.msk [vmem:[%s2878_s14 + $0x90] sm:$0xff] %vm1411_vm2, %v1343_v6 }
 0x11e   : > { %v1788_v12 = vpop.f32.mrb[4].mxu0 }
 0x11f   : > { %v1278_v35 = vadd.f32 %v1788_v12, %v2873_v26  ;;  %v1272_v51 = vpop.f32.mrb[5].mxu0 }
 0x120   : > { %v1273_v52 = vadd.f32 %v2873_v26, %v1272_v51 }
 0x121   : > { %1417 = vst.msk [vmem:[%s2878_s14 + $0x28] sm:$0xff] %vm1411_vm2, %v1278_v35 }
 0x122   : > { %v1812_v8 = vpop.f32.mrb[4].mxu1  ;;  %1416 = vst.msk [vmem:[%s2878_s14 + $0x20] sm:$0xff] %vm1411_vm2, %v1273_v52 }
 0x123   : > { %v1358_v16 = vadd.f32 %v1812_v8, %v2873_v26  ;;  %v1352_v39 = vpop.f32.mrb[5].mxu1 }
 0x124   : > { %v1353_v40 = vadd.f32 %v2873_v26, %v1352_v39 }
 0x125   : > { %1433 = vst.msk [vmem:[%s2878_s14 + $0xa8] sm:$0xff] %vm1411_vm2, %v1358_v16 }
 0x126   : > { %1432 = vst.msk [vmem:[%s2878_s14 + $0xa0] sm:$0xff] %vm1411_vm2, %v1353_v40 }
 0x12f   : > { %v1791_v57 = vpop.f32.mrb[6].mxu0 }
 0x130   : > { %v1288_v56 = vadd.f32 %v1791_v57, %v2873_v26  ;;  %v1282_v14 = vpop.f32.mrb[7].mxu0 }
 0x131   : > { %v1283_v25 = vadd.f32 %v2873_v26, %v1282_v14 }
 0x132   : > { %1419 = vst.msk [vmem:[%s2878_s14 + $0x38] sm:$0xff] %vm1411_vm2, %v1288_v56 }
 0x133   : > { %v1815_v54 = vpop.f32.mrb[6].mxu1  ;;  %1418 = vst.msk [vmem:[%s2878_s14 + $0x30] sm:$0xff] %vm1411_vm2, %v1283_v25 }
 0x134   : > { %v1368_v47 = vadd.f32 %v1815_v54, %v2873_v26  ;;  %v1362_v23 = vpop.f32.mrb[7].mxu1 }
 0x135   : > { %v1363_v36 = vadd.f32 %v2873_v26, %v1362_v23 }
 0x136   : > { %1435 = vst.msk [vmem:[%s2878_s14 + $0xb8] sm:$0xff] %vm1411_vm2, %v1368_v47 }
 0x137   : > { %1434 = vst.msk [vmem:[%s2878_s14 + $0xb0] sm:$0xff] %vm1411_vm2, %v1363_v36 }
 0x140   : > { %v1794_v10 = vpop.f32.mrb[8].mxu0 }
 0x141   : > { %v1298_v32 = vadd.f32 %v1794_v10, %v2873_v26  ;;  %v1292_v58 = vpop.f32.mrb[9].mxu0 }
 0x142   : > { %v1293_v5 = vadd.f32 %v2873_v26, %v1292_v58 }
 0x143   : > { %1421 = vst.msk [vmem:[%s2878_s14 + $0x48] sm:$0xff] %vm1411_vm2, %v1298_v32 }
 0x144   : > { %v1818_v55 = vpop.f32.mrb[8].mxu1  ;;  %1420 = vst.msk [vmem:[%s2878_s14 + $0x40] sm:$0xff] %vm1411_vm2, %v1293_v5 }
 0x145   : > { %v1378_v38 = vadd.f32 %v1818_v55, %v2873_v26  ;;  %v1372_v19 = vpop.f32.mrb[9].mxu1 }
 0x146   : > { %v1373_v62 = vadd.f32 %v2873_v26, %v1372_v19 }
 0x147   : > { %1437 = vst.msk [vmem:[%s2878_s14 + $0xc8] sm:$0xff] %vm1411_vm2, %v1378_v38 }
 0x148   : > { %1436 = vst.msk [vmem:[%s2878_s14 + $0xc0] sm:$0xff] %vm1411_vm2, %v1373_v62 }
 0x151   : > { %v1797_v13 = vpop.f32.mrb[10].mxu0 }
 0x152   : > { %v1308_v59 = vadd.f32 %v1797_v13, %v2873_v26  ;;  %v1302_v24 = vpop.f32.mrb[11].mxu0 }
 0x153   : > { %v1303_v30 = vadd.f32 %v2873_v26, %v1302_v24 }
 0x154   : > { %1423 = vst.msk [vmem:[%s2878_s14 + $0x58] sm:$0xff] %vm1411_vm2, %v1308_v59 }
 0x155   : > { %v1821_v15 = vpop.f32.mrb[10].mxu1  ;;  %1422 = vst.msk [vmem:[%s2878_s14 + $0x50] sm:$0xff] %vm1411_vm2, %v1303_v30 }
 0x156   : > { %v1388_v34 = vadd.f32 %v1821_v15, %v2873_v26  ;;  %v1382_v0 = vpop.f32.mrb[11].mxu1 }
 0x157   : > { %v1383_v46 = vadd.f32 %v2873_v26, %v1382_v0 }
 0x158   : > { %1439 = vst.msk [vmem:[%s2878_s14 + $0xd8] sm:$0xff] %vm1411_vm2, %v1388_v34 }
 0x159   : > { %1438 = vst.msk [vmem:[%s2878_s14 + $0xd0] sm:$0xff] %vm1411_vm2, %v1383_v46 }
 0x162   : > { %v1800_v21 = vpop.f32.mrb[12].mxu0 }
 0x163   : > { %v1318_v60 = vadd.f32 %v1800_v21, %v2873_v26  ;;  %v1312_v18 = vpop.f32.mrb[13].mxu0 }
 0x164   : > { %v1313_v37 = vadd.f32 %v2873_v26, %v1312_v18 }
 0x165   : > { %1425 = vst.msk [vmem:[%s2878_s14 + $0x68] sm:$0xff] %vm1411_vm2, %v1318_v60 }
 0x166   : > { %v1824_v27 = vpop.f32.mrb[12].mxu1  ;;  %1424 = vst.msk [vmem:[%s2878_s14 + $0x60] sm:$0xff] %vm1411_vm2, %v1313_v37 }
 0x167   : > { %v1398_v41 = vadd.f32 %v1824_v27, %v2873_v26  ;;  %v1392_v44 = vpop.f32.mrb[13].mxu1 }
 0x168   : > { %v1393_v9 = vadd.f32 %v2873_v26, %v1392_v44 }
 0x169   : > { %1441 = vst.msk [vmem:[%s2878_s14 + $0xe8] sm:$0xff] %vm1411_vm2, %v1398_v41 }
 0x16a   : > { %1440 = vst.msk [vmem:[%s2878_s14 + $0xe0] sm:$0xff] %vm1411_vm2, %v1393_v9 }
 0x173   : > { %v1803_v7 = vpop.f32.mrb[14].mxu0 }
 0x174   : > { %v1328_v50 = vadd.f32 %v1803_v7, %v2873_v26  ;;  %v1322_v17 = vpop.f32.mrb[15].mxu0 }
 0x175   : > { %v1323_v42 = vadd.f32 %v2873_v26, %v1322_v17 }
 0x176   : > { %1427 = vst.msk [vmem:[%s2878_s14 + $0x78] sm:$0xff] %vm1411_vm2, %v1328_v50  ;;  %v1827_v29 = vpop.f32.mrb[14].mxu1 }
 0x177   : > { %1426 = vst.msk [vmem:[%s2878_s14 + $0x70] sm:$0xff] %vm1411_vm2, %v1323_v42  ;;  %v1408_v61 = vadd.f32 %v1827_v29, %v2873_v26  ;;  %v1402_v31 = vpop.f32.mrb[15].mxu1 }
 0x178   : > { %v1403_v43 = vadd.f32 %v2873_v26, %v1402_v31 }
 0x179   : > { %1443 = vst.msk [vmem:[%s2878_s14 + $0xf8] sm:$0xff] %vm1411_vm2, %v1408_v61 }
 0x17a   : > { %1442 = vst.msk [vmem:[%s2878_s14 + $0xf0] sm:$0xff] %vm1411_vm2, %v1403_v43 }
 0x17b PF: > { %s14_s15 = sadd.s32 1, %s1854_s15  }
 0x17c   : > { %p11_p4 = scmp.ge.s32.totalorder %s14_s15, 4  }
 0x17e   :  { %13 = sbr.rel (!%p11_p4) target bundleno = 1 (0x1), region = 68 }

</bundles_post_ra>
